<compile_context>
chip_gen: v7x
topology: tpu7x:2x2x1
jax: 0.10.0
libtpu: 0.0.40
codegen_flags: <defaults>
</compile_context>

<pallas_src>
import jax
import jax.numpy as jnp
from jax import lax
from jax.experimental import pallas as pl
from jax.experimental.pallas import tpu as pltpu


def _round_up(v, m):
    return -(-v // m) * m


def _vmem_plan(b_blk, I, H, O_pad, mm_bytes):
    """Rough per-core VMEM budget: (bytes per streamed time row, fixed bytes,
    physical VMEM capacity)."""
    G = 4 * H
    Gp = _round_up(G, 128)
    Op = _round_up(O_pad, 128)
    bp = _round_up(b_blk, 8)
    # Streamed per-time-step cost: double-buffered x rows (lane-padded to 128)
    # plus the f32 layer-0 projection scratch rows.
    per_t = bp * (2 * _round_up(I, 128) * mm_bytes + Gp * 4)
    # Weight blocks (x2 pipeline buffers), biases, state scratch, out block,
    # plus slack for compiler-internal scratch.
    fixed = (2 * mm_bytes * Gp * (_round_up(I, 8) + _round_up(H, 8) + _round_up(2 * H, 8))
             + 2 * mm_bytes * _round_up(H, 8) * Op
             + 2 * 4 * (2 * Gp + Op)
             + 4 * 4 * bp * _round_up(H, 128)
             + 2 * 4 * bp * Op
             + (2 << 20))
    cap = 0
    try:
        cap = int(pltpu.get_tpu_info().vmem_capacity_bytes)
    except Exception:
        cap = 0
    if cap <= 0:
        cap = 64 << 20          # conservative default (v7x per-core VMEM)
    return per_t, fixed, cap


def _build_kernel(*, H, t_chunk, b_blk, T_valid, needs_mask, unroll, mm_dtype):
    G = 4 * H

    def kernel(x_ref,                                   # (t_chunk*b_blk, I)  mm_dtype
               wih0_ref, whh0_ref, b0_ref,              # (I,4H) (H,4H) (1,4H)
               w1_ref, b1_ref,                          # (2H,4H) (1,4H)
               wfc_ref, bfc_ref,                        # (H,Op) (1,Op)
               out_ref,                                 # (b_blk, Op)
               h0_ref, c0_ref, h1_ref, c1_ref,          # (b_blk, H) f32 state scratch
               xp_ref):                                 # (t_chunk*b_blk, 4H) f32 scratch
        ti = pl.program_id(1)
        first = ti == 0
        last = ti == pl.num_programs(1) - 1

        # Zero initial states (PyTorch default) at the start of each batch block.
        @pl.when(first)
        def _():
            h0_ref[...] = jnp.zeros_like(h0_ref)
            c0_ref[...] = jnp.zeros_like(c0_ref)
            h1_ref[...] = jnp.zeros_like(h1_ref)
            c1_ref[...] = jnp.zeros_like(c1_ref)

        # Hoisted layer-0 input projection for the whole chunk: one big MXU
        # matmul off the serial recurrence path, bias folded in, f32 accum.
        xp_ref[...] = (jnp.dot(x_ref[...], wih0_ref[...],
                               preferred_element_type=jnp.float32)
                       + b0_ref[...])

        # Hoisted weight loads / bias broadcast (no per-step broadcast_in_dim).
        whh0 = whh0_ref[...]
        w1 = w1_ref[...]
        b1b = jnp.broadcast_to(b1_ref[...], (b_blk, G))

        # Gate order (i, f, g, o); g lanes [2H, 3H) want tanh.  The 2x
        # pre-scale is folded into those weight columns, so ONE full-width EUP
        # sigmoid + a VPU fix-up recovers tanh(z) = 2*sigmoid(2z) - 1.
        lane = lax.broadcasted_iota(jnp.int32, (b_blk, G), 1)
        g_lane = (lane >= 2 * H) & (lane < 3 * H)

        def act(g):
            s = jax.nn.sigmoid(g)                        # single EUP pass
            return jnp.where(g_lane, 2.0 * s - 1.0, s)   # VPU fix-up

        # TODO(synk): for H < 128 the i/f/g/o quarter slices below are sub-vreg
        # lane slices; a pltpu.roll-based realignment (XLU slot) could shave a
        # little more VPU work but is not implemented here.
        def step(t, carry):
            h0, c0, h1, c1 = carry
            r0 = pl.multiple_of(t * b_blk, b_blk)
            xp_t = xp_ref[pl.ds(r0, b_blk), :]           # (b_blk, 4H) f32

            # ---- layer 0 (input projection precomputed) ----
            g0 = xp_t + jnp.dot(h0.astype(mm_dtype), whh0,
                                preferred_element_type=jnp.float32)
            a0 = act(g0)
            c0n = a0[:, H:2 * H] * c0 + a0[:, 0:H] * a0[:, 2 * H:3 * H]
            h0n = a0[:, 3 * H:4 * H] * jnp.tanh(c0n)

            # ---- layer 1: both dots fused into one stacked matmul ----
            h01 = jnp.concatenate([h0n, h1], axis=1).astype(mm_dtype)
            g1 = jnp.dot(h01, w1, preferred_element_type=jnp.float32) + b1b
            a1 = act(g1)
            c1n = a1[:, H:2 * H] * c1 + a1[:, 0:H] * a1[:, 2 * H:3 * H]
            h1n = a1[:, 3 * H:4 * H] * jnp.tanh(c1n)

            if needs_mask:
                # Padded timesteps (T padded to a multiple of t_chunk) must not
                # update the LSTM state.
                valid = (ti * t_chunk + t) < T_valid
                h0n = jnp.where(valid, h0n, h0)
                c0n = jnp.where(valid, c0n, c0)
                h1n = jnp.where(valid, h1n, h1)
                c1n = jnp.where(valid, c1n, c1)
            return (h0n, c0n, h1n, c1n)

        carry0 = (h0_ref[...], c0_ref[...], h1_ref[...], c1_ref[...])
        h0, c0, h1, c1 = lax.fori_loop(0, t_chunk, step, carry0, unroll=unroll)

        # Persist states once per chunk (not per timestep).
        h0_ref[...] = h0
        c0_ref[...] = c0
        h1_ref[...] = h1
        c1_ref[...] = c1

        # fc(hn[-1]) — final hidden state of the top layer, written once into a
        # lane-dense (b_blk, 128-multiple) block.
        @pl.when(last)
        def _():
            out_ref[...] = (jnp.dot(h1.astype(mm_dtype), wfc_ref[...],
                                    preferred_element_type=jnp.float32)
                            + bfc_ref[...])

    return kernel


def speaker_rnn_forward(x, params, *, matmul_dtype=jnp.bfloat16,
                        t_chunk=None, b_blk=None):
    """x: (B, T, input_size) batch_first, float32. Returns (B, output_size).

    matmul_dtype: dtype of MXU operands (weights, x, recurrent h). bfloat16 is
    the fast default (f32 accumulation, elementwise math f32); pass jnp.float32
    for bit-faithful-to-PyTorch matmuls.
    """
    B, T, I = x.shape
    H = params["whh0"].shape[0]
    O = params["wfc"].shape[1]
    G = 4 * H
    mm_dtype = jnp.dtype(matmul_dtype)
    mm_bytes = mm_dtype.itemsize

    B_pad = _round_up(B, 8)
    O_pad = _round_up(O, 128)

    # Batch blocks: >= 2 blocks (each a whole sublane tile) lets the "parallel"
    # grid axis use v7x's second TensorCore; harmless single block otherwise.
    if b_blk is None:
        b_blk = B_pad // 2 if (B_pad >= 16 and B_pad % 16 == 0) else B_pad
    assert B_pad % b_blk == 0 and b_blk % 8 == 0, "bad batch block"
    nb = B_pad // b_blk

    # Chip-aware VMEM plan -> time chunk + scoped-VMEM limit.
    per_t, fixed, cap = _vmem_plan(b_blk, I, H, O_pad, mm_bytes)
    if t_chunk is None:
        budget = int(cap * 0.6)
        t_chunk = int(max(1, min(T, 512, (budget - fixed) // per_t)))
    t_chunk = int(t_chunk)
    # bf16 blocks want the second-minor block dim to be a multiple of 16.
    if mm_bytes == 2 and (b_blk % 16 != 0) and (t_chunk % 2 != 0):
        t_chunk += 1
    need = fixed + per_t * t_chunk
    vmem_limit = int(min(cap, max(need + (4 << 20), 32 << 20)))

    T_pad = _round_up(T, t_chunk)
    needs_mask = T_pad != T

    # Time-major, batch-padded, time-padded; regrouped into per-batch-block
    # flat (time-major) slabs so the layer-0 input projection is one 2-D MXU
    # matmul per chunk and no in-kernel reshape is needed.
    x_tbi = jnp.transpose(x, (1, 0, 2))
    if B_pad != B:
        x_tbi = jnp.pad(x_tbi, ((0, 0), (0, B_pad - B), (0, 0)))
    if T_pad != T:
        x_tbi = jnp.pad(x_tbi, ((0, T_pad - T), (0, 0), (0, 0)))
    x_blk = (x_tbi.reshape(T_pad, nb, b_blk, I)
                  .transpose(1, 0, 2, 3)
                  .reshape(nb, T_pad * b_blk, I)
                  .astype(mm_dtype))

    # Weight prep: fold the 2x tanh-via-sigmoid pre-scale into the g-gate
    # columns, stack layer-1's input/hidden weights, pad the head to 128 lanes.
    g_scale = jnp.ones((G,), jnp.float32).at[2 * H:3 * H].set(2.0)
    wih0 = (params["wih0"] * g_scale).astype(mm_dtype)
    whh0 = (params["whh0"] * g_scale).astype(mm_dtype)
    b0 = params["b0"] * g_scale
    w1 = (jnp.concatenate([params["wih1"], params["whh1"]], axis=0)
          * g_scale).astype(mm_dtype)
    b1 = params["b1"] * g_scale
    wfc, bfc = params["wfc"], params["bfc"]
    if O_pad != O:
        wfc = jnp.pad(wfc, ((0, 0), (0, O_pad - O)))
        bfc = jnp.pad(bfc, ((0, 0), (0, O_pad - O)))
    wfc = wfc.astype(mm_dtype)

    kernel = _build_kernel(H=H, t_chunk=t_chunk, b_blk=b_blk, T_valid=T,
                           needs_mask=needs_mask, unroll=min(8, t_chunk),
                           mm_dtype=mm_dtype)

    grid = (nb, T_pad // t_chunk)

    out = pl.pallas_call(
        kernel,
        out_shape=jax.ShapeDtypeStruct((B_pad, O_pad), jnp.float32),
        grid_spec=pltpu.PrefetchScalarGridSpec(
            num_scalar_prefetch=0,
            grid=grid,
            in_specs=[
                pl.BlockSpec((None, t_chunk * b_blk, I),
                             lambda bi, ti: (bi, ti, 0)),                 # x chunk
                pl.BlockSpec((I, G), lambda bi, ti: (0, 0)),              # wih0
                pl.BlockSpec((H, G), lambda bi, ti: (0, 0)),              # whh0
                pl.BlockSpec((1, G), lambda bi, ti: (0, 0)),              # b0
                pl.BlockSpec((2 * H, G), lambda bi, ti: (0, 0)),          # w1 (stacked)
                pl.BlockSpec((1, G), lambda bi, ti: (0, 0)),              # b1
                pl.BlockSpec((H, O_pad), lambda bi, ti: (0, 0)),          # wfc
                pl.BlockSpec((1, O_pad), lambda bi, ti: (0, 0)),          # bfc
            ],
            out_specs=pl.BlockSpec((b_blk, O_pad), lambda bi, ti: (bi, 0)),
            scratch_shapes=[
                pltpu.VMEM((b_blk, H), jnp.float32),                # h layer0
                pltpu.VMEM((b_blk, H), jnp.float32),                # c layer0
                pltpu.VMEM((b_blk, H), jnp.float32),                # h layer1
                pltpu.VMEM((b_blk, H), jnp.float32),                # c layer1
                pltpu.VMEM((t_chunk * b_blk, G), jnp.float32),      # xproj chunk
            ],
        ),
        compiler_params=pltpu.CompilerParams(
            dimension_semantics=("parallel", "arbitrary"),   # batch ∥, time sequential
            vmem_limit_bytes=vmem_limit,
        ),
    )(x_blk, wih0, whh0, b0, w1, b1, wfc, bfc)

    return out[:B, :O]


def init_params(key, input_size, hidden_size, output_size):
    """Deterministic init matching PyTorch LSTM/Linear parameter shapes.

    PyTorch stores weight_ih_l{k}: (4H, in), weight_hh_l{k}: (4H, H),
    bias_ih/bias_hh: (4H,).  We pre-transpose weights to (in, 4H)/(H, 4H)
    and fold the two biases into one (1, 4H).
    """
    k = 1.0 / jnp.sqrt(hidden_size)
    ks = jax.random.split(key, 10)
    u = lambda kk, shape: jax.random.uniform(kk, shape, jnp.float32, -k, k)
    H = hidden_size
    return {
        "wih0": u(ks[0], (input_size, 4 * H)),
        "whh0": u(ks[1], (H, 4 * H)),
        "b0":   u(ks[2], (1, 4 * H)) + u(ks[3], (1, 4 * H)),  # bias_ih + bias_hh
        "wih1": u(ks[4], (H, 4 * H)),
        "whh1": u(ks[5], (H, 4 * H)),
        "b1":   u(ks[6], (1, 4 * H)) + u(ks[7], (1, 4 * H)),
        "wfc":  u(ks[8], (H, output_size)),
        "bfc":  u(ks[9], (1, output_size)),
    }


def reference_forward(x, params):
    """Pure-JAX reference of the PyTorch forward (for a correctness check)."""
    B, T, _ = x.shape
    H = params["whh0"].shape[0]

    def cell(x_t, h, c, wih, whh, b):
        g = x_t @ wih + h @ whh + b
        i = jax.nn.sigmoid(g[:, 0 * H:1 * H])
        f = jax.nn.sigmoid(g[:, 1 * H:2 * H])
        gg = jnp.tanh(g[:, 2 * H:3 * H])
        o = jax.nn.sigmoid(g[:, 3 * H:4 * H])
        c = f * c + i * gg
        h = o * jnp.tanh(c)
        return h, c

    h0 = c0 = h1 = c1 = jnp.zeros((B, H), jnp.float32)
    for t in range(T):
        h0, c0 = cell(x[:, t, :], h0, c0, params["wih0"], params["whh0"], params["b0"])
        h1, c1 = cell(h0, h1, c1, params["wih1"], params["whh1"], params["b1"])
    return h1 @ params["wfc"] + params["bfc"]


if __name__ == "__main__":
    B, T = 2, 8
    INPUT_SIZE, HIDDEN_SIZE, OUTPUT_SIZE = 16, 32, 10

    key = jax.random.PRNGKey(0)
    k_x, k_p = jax.random.split(key)
    x = jax.random.normal(k_x, (B, T, INPUT_SIZE), jnp.float32)
    params = init_params(k_p, INPUT_SIZE, HIDDEN_SIZE, OUTPUT_SIZE)

    ref = reference_forward(x, params)

    # Exact-semantics path (f32 matmul operands).
    out_f32 = jax.block_until_ready(
        speaker_rnn_forward(x, params, matmul_dtype=jnp.float32))
    assert out_f32.shape == (B, OUTPUT_SIZE)
    assert jnp.allclose(out_f32, ref, atol=1e-4, rtol=1e-4), "f32 mismatch vs reference"

    # Fast path (bf16 matmul operands, f32 accumulation) — default.
    out_bf16 = jax.block_until_ready(speaker_rnn_forward(x, params))
    assert out_bf16.shape == (B, OUTPUT_SIZE)
    assert jnp.allclose(out_bf16, ref, atol=5e-2, rtol=5e-2), "bf16 mismatch vs reference"

    print("KERNEL_OK")
</pallas_src>

<mosaic_0001>
module attributes {stable_mosaic.version = 11 : i64} {
  func.func @kernel(%arg0: i32, %arg1: i32, %arg2: memref<1x64x16xf32, #tpu.memory_space<vmem>>, %arg3: memref<16x128xf32, #tpu.memory_space<vmem>>, %arg4: memref<32x128xf32, #tpu.memory_space<vmem>>, %arg5: memref<1x128xf32, #tpu.memory_space<vmem>>, %arg6: memref<64x128xf32, #tpu.memory_space<vmem>>, %arg7: memref<1x128xf32, #tpu.memory_space<vmem>>, %arg8: memref<32x128xf32, #tpu.memory_space<vmem>>, %arg9: memref<1x128xf32, #tpu.memory_space<vmem>>, %arg10: memref<8x128xf32, #tpu.memory_space<vmem>>, %arg11: memref<8x32xf32, #tpu.memory_space<vmem>>, %arg12: memref<8x32xf32, #tpu.memory_space<vmem>>, %arg13: memref<8x32xf32, #tpu.memory_space<vmem>>, %arg14: memref<8x32xf32, #tpu.memory_space<vmem>>, %arg15: memref<64x128xf32, #tpu.memory_space<vmem>>) attributes {dimension_semantics = [#tpu.dimension_semantics<parallel>, #tpu.dimension_semantics<arbitrary>], iteration_bounds = array<i64: 1, 1>, scalar_prefetch = 0 : i64, scratch_operands = 5 : i64, tpu.core_type = #tpu.core_type<tc>, window_params = [{transform_indices = @transform_0, window_bounds = array<i64: 1, 64, 16>}, {pipeline_mode = #tpu.pipeline_mode<synchronous>, transform_indices = @transform_1, window_bounds = array<i64: 16, 128>}, {pipeline_mode = #tpu.pipeline_mode<synchronous>, transform_indices = @transform_2, window_bounds = array<i64: 32, 128>}, {pipeline_mode = #tpu.pipeline_mode<synchronous>, transform_indices = @transform_3, window_bounds = array<i64: 1, 128>}, {pipeline_mode = #tpu.pipeline_mode<synchronous>, transform_indices = @transform_4, window_bounds = array<i64: 64, 128>}, {pipeline_mode = #tpu.pipeline_mode<synchronous>, transform_indices = @transform_5, window_bounds = array<i64: 1, 128>}, {pipeline_mode = #tpu.pipeline_mode<synchronous>, transform_indices = @transform_6, window_bounds = array<i64: 32, 128>}, {pipeline_mode = #tpu.pipeline_mode<synchronous>, transform_indices = @transform_7, window_bounds = array<i64: 1, 128>}, {transform_indices = @transform_8, window_bounds = array<i64: 8, 128>}]} {
    %c0_i32 = arith.constant 0 : i32
    %0 = arith.cmpi eq, %arg1, %c0_i32 : i32
    %c0_i32_0 = arith.constant 0 : i32
    %1 = arith.cmpi eq, %arg1, %c0_i32_0 : i32
    %2 = arith.extui %0 : i1 to i32
    %c0_i32_1 = arith.constant 0 : i32
    %3 = arith.cmpi ne, %2, %c0_i32_1 : i32
    scf.if %3 {
      %cst_114 = arith.constant 0.000000e+00 : f32
      %409 = vector.broadcast %cst_114 : f32 to vector<8x32xf32>
      %c0_115 = arith.constant 0 : index
      %c0_116 = arith.constant 0 : index
      %410 = vector.load %arg11[%c0_115, %c0_116] : memref<8x32xf32, #tpu.memory_space<vmem>>, vector<8x32xf32>
      tpu.vector_store %arg11[%c0_115, %c0_116], %409 {strides = array<i32>} : memref<8x32xf32, #tpu.memory_space<vmem>>, vector<8x32xf32>,
      %cst_117 = arith.constant 0.000000e+00 : f32
      %411 = vector.broadcast %cst_117 : f32 to vector<8x32xf32>
      %c0_118 = arith.constant 0 : index
      %c0_119 = arith.constant 0 : index
      %412 = vector.load %arg12[%c0_118, %c0_119] : memref<8x32xf32, #tpu.memory_space<vmem>>, vector<8x32xf32>
      tpu.vector_store %arg12[%c0_118, %c0_119], %411 {strides = array<i32>} : memref<8x32xf32, #tpu.memory_space<vmem>>, vector<8x32xf32>,
      %cst_120 = arith.constant 0.000000e+00 : f32
      %413 = vector.broadcast %cst_120 : f32 to vector<8x32xf32>
      %c0_121 = arith.constant 0 : index
      %c0_122 = arith.constant 0 : index
      %414 = vector.load %arg13[%c0_121, %c0_122] : memref<8x32xf32, #tpu.memory_space<vmem>>, vector<8x32xf32>
      tpu.vector_store %arg13[%c0_121, %c0_122], %413 {strides = array<i32>} : memref<8x32xf32, #tpu.memory_space<vmem>>, vector<8x32xf32>,
      %cst_123 = arith.constant 0.000000e+00 : f32
      %415 = vector.broadcast %cst_123 : f32 to vector<8x32xf32>
      %c0_124 = arith.constant 0 : index
      %c0_125 = arith.constant 0 : index
      %416 = vector.load %arg14[%c0_124, %c0_125] : memref<8x32xf32, #tpu.memory_space<vmem>>, vector<8x32xf32>
      tpu.vector_store %arg14[%c0_124, %c0_125], %415 {strides = array<i32>} : memref<8x32xf32, #tpu.memory_space<vmem>>, vector<8x32xf32>,
    } else {
    }
    %c0 = arith.constant 0 : index
    %c0_2 = arith.constant 0 : index
    %c0_3 = arith.constant 0 : index
    %4 = vector.load %arg2[%c0, %c0_2, %c0_3] : memref<1x64x16xf32, #tpu.memory_space<vmem>>, vector<1x64x16xf32>
    %5 = vector.shape_cast %4 : vector<1x64x16xf32> to vector<64x16xf32>
    %c0_4 = arith.constant 0 : index
    %c0_5 = arith.constant 0 : index
    %6 = vector.load %arg3[%c0_4, %c0_5] : memref<16x128xf32, #tpu.memory_space<vmem>>, vector<16x128xf32>
    %cst = arith.constant dense<0.000000e+00> : vector<64x128xf32>
    %7 = tpu.matmul %5, %6, %cst {dimension_numbers = #tpu.dot_dimension_numbers<[1], [0], [0], [1], [0, 0, 1, 1], [], []>} : vector<64x16xf32>, vector<16x128xf32>, vector<64x128xf32> -> vector<64x128xf32>
    %c0_6 = arith.constant 0 : index
    %c0_7 = arith.constant 0 : index
    %8 = vector.load %arg5[%c0_6, %c0_7] : memref<1x128xf32, #tpu.memory_space<vmem>>, vector<1x128xf32>
    %9 = vector.broadcast %8 : vector<1x128xf32> to vector<64x128xf32>
    %10 = arith.addf %7, %9 : vector<64x128xf32>
    %c0_8 = arith.constant 0 : index
    %c0_9 = arith.constant 0 : index
    %11 = vector.load %arg15[%c0_8, %c0_9] : memref<64x128xf32, #tpu.memory_space<vmem>>, vector<64x128xf32>
    tpu.vector_store %arg15[%c0_8, %c0_9], %10 {strides = array<i32>} : memref<64x128xf32, #tpu.memory_space<vmem>>, vector<64x128xf32>,
    %c0_10 = arith.constant 0 : index
    %c0_11 = arith.constant 0 : index
    %12 = vector.load %arg4[%c0_10, %c0_11] : memref<32x128xf32, #tpu.memory_space<vmem>>, vector<32x128xf32>
    %c0_12 = arith.constant 0 : index
    %c0_13 = arith.constant 0 : index
    %13 = vector.load %arg6[%c0_12, %c0_13] : memref<64x128xf32, #tpu.memory_space<vmem>>, vector<64x128xf32>
    %c0_14 = arith.constant 0 : index
    %c0_15 = arith.constant 0 : index
    %14 = vector.load %arg7[%c0_14, %c0_15] : memref<1x128xf32, #tpu.memory_space<vmem>>, vector<1x128xf32>
    %15 = vector.shape_cast %14 : vector<1x128xf32> to vector<1x128xf32>
    %16 = vector.broadcast %15 : vector<1x128xf32> to vector<8x128xf32>
    %17 = tpu.iota {dimensions = array<i32: 1>} : vector<8x128xi32>
    %c64_i32 = arith.constant 64 : i32
    %18 = vector.broadcast %c64_i32 : i32 to vector<8x128xi32>
    %19 = arith.cmpi sge, %17, %18 : vector<8x128xi32>
    %c96_i32 = arith.constant 96 : i32
    %20 = vector.broadcast %c96_i32 : i32 to vector<8x128xi32>
    %21 = arith.cmpi slt, %17, %20 : vector<8x128xi32>
    %22 = arith.andi %19, %21 : vector<8x128xi1>
    %c0_16 = arith.constant 0 : index
    %c0_17 = arith.constant 0 : index
    %23 = vector.load %arg11[%c0_16, %c0_17] : memref<8x32xf32, #tpu.memory_space<vmem>>, vector<8x32xf32>
    %c0_18 = arith.constant 0 : index
    %c0_19 = arith.constant 0 : index
    %24 = vector.load %arg12[%c0_18, %c0_19] : memref<8x32xf32, #tpu.memory_space<vmem>>, vector<8x32xf32>
    %c0_20 = arith.constant 0 : index
    %c0_21 = arith.constant 0 : index
    %25 = vector.load %arg13[%c0_20, %c0_21] : memref<8x32xf32, #tpu.memory_space<vmem>>, vector<8x32xf32>
    %c0_22 = arith.constant 0 : index
    %c0_23 = arith.constant 0 : index
    %26 = vector.load %arg14[%c0_22, %c0_23] : memref<8x32xf32, #tpu.memory_space<vmem>>, vector<8x32xf32>
    %c0_i32_24 = arith.constant 0 : i32
    %c8_i32 = arith.constant 8 : i32
    %27 = arith.muli %c0_i32_24, %c8_i32 : i32
    %28 = tpu.assume_multiple %27, 8 : i32
    %29 = arith.index_cast %28 : i32 to index
    %c0_25 = arith.constant 0 : index
    %30 = vector.load %arg15[%29, %c0_25] : memref<64x128xf32, #tpu.memory_space<vmem>>, vector<8x128xf32>
    %cst_26 = arith.constant dense<0.000000e+00> : vector<8x128xf32>
    %31 = tpu.matmul %23, %12, %cst_26 {dimension_numbers = #tpu.dot_dimension_numbers<[1], [0], [0], [1], [0, 0, 1, 1], [], []>} : vector<8x32xf32>, vector<32x128xf32>, vector<8x128xf32> -> vector<8x128xf32>
    %32 = arith.addf %30, %31 : vector<8x128xf32>
    %33 = arith.negf %32 : vector<8x128xf32>
    %34 = math.exp %33 : vector<8x128xf32>
    %cst_27 = arith.constant 1.000000e+00 : f32
    %35 = vector.broadcast %cst_27 : f32 to vector<8x128xf32>
    %36 = arith.addf %35, %34 : vector<8x128xf32>
    %37 = arith.divf %35, %36 : vector<8x128xf32>
    %cst_28 = arith.constant 2.000000e+00 : f32
    %38 = vector.broadcast %cst_28 : f32 to vector<8x128xf32>
    %39 = arith.mulf %38, %37 : vector<8x128xf32>
    %cst_29 = arith.constant 1.000000e+00 : f32
    %40 = vector.broadcast %cst_29 : f32 to vector<8x128xf32>
    %41 = arith.subf %39, %40 : vector<8x128xf32>
    %42 = arith.select %22, %41, %37 : vector<8x128xi1>, vector<8x128xf32>
    %43 = vector.extract_strided_slice %42 {offsets = [0, 32], sizes = [8, 32], strides = [1, 1]} : vector<8x128xf32> to vector<8x32xf32>
    %44 = arith.mulf %43, %24 : vector<8x32xf32>
    %45 = vector.extract_strided_slice %42 {offsets = [0, 0], sizes = [8, 32], strides = [1, 1]} : vector<8x128xf32> to vector<8x32xf32>
    %46 = vector.extract_strided_slice %42 {offsets = [0, 64], sizes = [8, 32], strides = [1, 1]} : vector<8x128xf32> to vector<8x32xf32>
    %47 = arith.mulf %45, %46 : vector<8x32xf32>
    %48 = arith.addf %44, %47 : vector<8x32xf32>
    %49 = vector.extract_strided_slice %42 {offsets = [0, 96], sizes = [8, 32], strides = [1, 1]} : vector<8x128xf32> to vector<8x32xf32>
    %50 = math.tanh %48 : vector<8x32xf32>
    %51 = arith.mulf %49, %50 : vector<8x32xf32>
    %52 = tpu.concatenate %51, %25 in 1 : vector<8x32xf32>, vector<8x32xf32> -> vector<8x64xf32>
    %cst_30 = arith.constant dense<0.000000e+00> : vector<8x128xf32>
    %53 = tpu.matmul %52, %13, %cst_30 {dimension_numbers = #tpu.dot_dimension_numbers<[1], [0], [0], [1], [0, 0, 1, 1], [], []>} : vector<8x64xf32>, vector<64x128xf32>, vector<8x128xf32> -> vector<8x128xf32>
    %54 = arith.addf %53, %16 : vector<8x128xf32>
    %55 = arith.negf %54 : vector<8x128xf32>
    %56 = math.exp %55 : vector<8x128xf32>
    %cst_31 = arith.constant 1.000000e+00 : f32
    %57 = vector.broadcast %cst_31 : f32 to vector<8x128xf32>
    %58 = arith.addf %57, %56 : vector<8x128xf32>
    %59 = arith.divf %57, %58 : vector<8x128xf32>
    %cst_32 = arith.constant 2.000000e+00 : f32
    %60 = vector.broadcast %cst_32 : f32 to vector<8x128xf32>
    %61 = arith.mulf %60, %59 : vector<8x128xf32>
    %cst_33 = arith.constant 1.000000e+00 : f32
    %62 = vector.broadcast %cst_33 : f32 to vector<8x128xf32>
    %63 = arith.subf %61, %62 : vector<8x128xf32>
    %64 = arith.select %22, %63, %59 : vector<8x128xi1>, vector<8x128xf32>
    %65 = vector.extract_strided_slice %64 {offsets = [0, 32], sizes = [8, 32], strides = [1, 1]} : vector<8x128xf32> to vector<8x32xf32>
    %66 = arith.mulf %65, %26 : vector<8x32xf32>
    %67 = vector.extract_strided_slice %64 {offsets = [0, 0], sizes = [8, 32], strides = [1, 1]} : vector<8x128xf32> to vector<8x32xf32>
    %68 = vector.extract_strided_slice %64 {offsets = [0, 64], sizes = [8, 32], strides = [1, 1]} : vector<8x128xf32> to vector<8x32xf32>
    %69 = arith.mulf %67, %68 : vector<8x32xf32>
    %70 = arith.addf %66, %69 : vector<8x32xf32>
    %71 = vector.extract_strided_slice %64 {offsets = [0, 96], sizes = [8, 32], strides = [1, 1]} : vector<8x128xf32> to vector<8x32xf32>
    %72 = math.tanh %70 : vector<8x32xf32>
    %73 = arith.mulf %71, %72 : vector<8x32xf32>
    %c1_i32 = arith.constant 1 : i32
    %c8_i32_34 = arith.constant 8 : i32
    %74 = arith.muli %c1_i32, %c8_i32_34 : i32
    %75 = tpu.assume_multiple %74, 8 : i32
    %76 = arith.index_cast %75 : i32 to index
    %c0_35 = arith.constant 0 : index
    %77 = vector.load %arg15[%76, %c0_35] : memref<64x128xf32, #tpu.memory_space<vmem>>, vector<8x128xf32>
    %cst_36 = arith.constant dense<0.000000e+00> : vector<8x128xf32>
    %78 = tpu.matmul %51, %12, %cst_36 {dimension_numbers = #tpu.dot_dimension_numbers<[1], [0], [0], [1], [0, 0, 1, 1], [], []>} : vector<8x32xf32>, vector<32x128xf32>, vector<8x128xf32> -> vector<8x128xf32>
    %79 = arith.addf %77, %78 : vector<8x128xf32>
    %80 = arith.negf %79 : vector<8x128xf32>
    %81 = math.exp %80 : vector<8x128xf32>
    %cst_37 = arith.constant 1.000000e+00 : f32
    %82 = vector.broadcast %cst_37 : f32 to vector<8x128xf32>
    %83 = arith.addf %82, %81 : vector<8x128xf32>
    %84 = arith.divf %82, %83 : vector<8x128xf32>
    %cst_38 = arith.constant 2.000000e+00 : f32
    %85 = vector.broadcast %cst_38 : f32 to vector<8x128xf32>
    %86 = arith.mulf %85, %84 : vector<8x128xf32>
    %cst_39 = arith.constant 1.000000e+00 : f32
    %87 = vector.broadcast %cst_39 : f32 to vector<8x128xf32>
    %88 = arith.subf %86, %87 : vector<8x128xf32>
    %89 = arith.select %22, %88, %84 : vector<8x128xi1>, vector<8x128xf32>
    %90 = vector.extract_strided_slice %89 {offsets = [0, 32], sizes = [8, 32], strides = [1, 1]} : vector<8x128xf32> to vector<8x32xf32>
    %91 = arith.mulf %90, %48 : vector<8x32xf32>
    %92 = vector.extract_strided_slice %89 {offsets = [0, 0], sizes = [8, 32], strides = [1, 1]} : vector<8x128xf32> to vector<8x32xf32>
    %93 = vector.extract_strided_slice %89 {offsets = [0, 64], sizes = [8, 32], strides = [1, 1]} : vector<8x128xf32> to vector<8x32xf32>
    %94 = arith.mulf %92, %93 : vector<8x32xf32>
    %95 = arith.addf %91, %94 : vector<8x32xf32>
    %96 = vector.extract_strided_slice %89 {offsets = [0, 96], sizes = [8, 32], strides = [1, 1]} : vector<8x128xf32> to vector<8x32xf32>
    %97 = math.tanh %95 : vector<8x32xf32>
    %98 = arith.mulf %96, %97 : vector<8x32xf32>
    %99 = tpu.concatenate %98, %73 in 1 : vector<8x32xf32>, vector<8x32xf32> -> vector<8x64xf32>
    %cst_40 = arith.constant dense<0.000000e+00> : vector<8x128xf32>
    %100 = tpu.matmul %99, %13, %cst_40 {dimension_numbers = #tpu.dot_dimension_numbers<[1], [0], [0], [1], [0, 0, 1, 1], [], []>} : vector<8x64xf32>, vector<64x128xf32>, vector<8x128xf32> -> vector<8x128xf32>
    %101 = arith.addf %100, %16 : vector<8x128xf32>
    %102 = arith.negf %101 : vector<8x128xf32>
    %103 = math.exp %102 : vector<8x128xf32>
    %cst_41 = arith.constant 1.000000e+00 : f32
    %104 = vector.broadcast %cst_41 : f32 to vector<8x128xf32>
    %105 = arith.addf %104, %103 : vector<8x128xf32>
    %106 = arith.divf %104, %105 : vector<8x128xf32>
    %cst_42 = arith.constant 2.000000e+00 : f32
    %107 = vector.broadcast %cst_42 : f32 to vector<8x128xf32>
    %108 = arith.mulf %107, %106 : vector<8x128xf32>
    %cst_43 = arith.constant 1.000000e+00 : f32
    %109 = vector.broadcast %cst_43 : f32 to vector<8x128xf32>
    %110 = arith.subf %108, %109 : vector<8x128xf32>
    %111 = arith.select %22, %110, %106 : vector<8x128xi1>, vector<8x128xf32>
    %112 = vector.extract_strided_slice %111 {offsets = [0, 32], sizes = [8, 32], strides = [1, 1]} : vector<8x128xf32> to vector<8x32xf32>
    %113 = arith.mulf %112, %70 : vector<8x32xf32>
    %114 = vector.extract_strided_slice %111 {offsets = [0, 0], sizes = [8, 32], strides = [1, 1]} : vector<8x128xf32> to vector<8x32xf32>
    %115 = vector.extract_strided_slice %111 {offsets = [0, 64], sizes = [8, 32], strides = [1, 1]} : vector<8x128xf32> to vector<8x32xf32>
    %116 = arith.mulf %114, %115 : vector<8x32xf32>
    %117 = arith.addf %113, %116 : vector<8x32xf32>
    %118 = vector.extract_strided_slice %111 {offsets = [0, 96], sizes = [8, 32], strides = [1, 1]} : vector<8x128xf32> to vector<8x32xf32>
    %119 = math.tanh %117 : vector<8x32xf32>
    %120 = arith.mulf %118, %119 : vector<8x32xf32>
    %c2_i32 = arith.constant 2 : i32
    %c8_i32_44 = arith.constant 8 : i32
    %121 = arith.muli %c2_i32, %c8_i32_44 : i32
    %122 = tpu.assume_multiple %121, 8 : i32
    %123 = arith.index_cast %122 : i32 to index
    %c0_45 = arith.constant 0 : index
    %124 = vector.load %arg15[%123, %c0_45] : memref<64x128xf32, #tpu.memory_space<vmem>>, vector<8x128xf32>
    %cst_46 = arith.constant dense<0.000000e+00> : vector<8x128xf32>
    %125 = tpu.matmul %98, %12, %cst_46 {dimension_numbers = #tpu.dot_dimension_numbers<[1], [0], [0], [1], [0, 0, 1, 1], [], []>} : vector<8x32xf32>, vector<32x128xf32>, vector<8x128xf32> -> vector<8x128xf32>
    %126 = arith.addf %124, %125 : vector<8x128xf32>
    %127 = arith.negf %126 : vector<8x128xf32>
    %128 = math.exp %127 : vector<8x128xf32>
    %cst_47 = arith.constant 1.000000e+00 : f32
    %129 = vector.broadcast %cst_47 : f32 to vector<8x128xf32>
    %130 = arith.addf %129, %128 : vector<8x128xf32>
    %131 = arith.divf %129, %130 : vector<8x128xf32>
    %cst_48 = arith.constant 2.000000e+00 : f32
    %132 = vector.broadcast %cst_48 : f32 to vector<8x128xf32>
    %133 = arith.mulf %132, %131 : vector<8x128xf32>
    %cst_49 = arith.constant 1.000000e+00 : f32
    %134 = vector.broadcast %cst_49 : f32 to vector<8x128xf32>
    %135 = arith.subf %133, %134 : vector<8x128xf32>
    %136 = arith.select %22, %135, %131 : vector<8x128xi1>, vector<8x128xf32>
    %137 = vector.extract_strided_slice %136 {offsets = [0, 32], sizes = [8, 32], strides = [1, 1]} : vector<8x128xf32> to vector<8x32xf32>
    %138 = arith.mulf %137, %95 : vector<8x32xf32>
    %139 = vector.extract_strided_slice %136 {offsets = [0, 0], sizes = [8, 32], strides = [1, 1]} : vector<8x128xf32> to vector<8x32xf32>
    %140 = vector.extract_strided_slice %136 {offsets = [0, 64], sizes = [8, 32], strides = [1, 1]} : vector<8x128xf32> to vector<8x32xf32>
    %141 = arith.mulf %139, %140 : vector<8x32xf32>
    %142 = arith.addf %138, %141 : vector<8x32xf32>
    %143 = vector.extract_strided_slice %136 {offsets = [0, 96], sizes = [8, 32], strides = [1, 1]} : vector<8x128xf32> to vector<8x32xf32>
    %144 = math.tanh %142 : vector<8x32xf32>
    %145 = arith.mulf %143, %144 : vector<8x32xf32>
    %146 = tpu.concatenate %145, %120 in 1 : vector<8x32xf32>, vector<8x32xf32> -> vector<8x64xf32>
    %cst_50 = arith.constant dense<0.000000e+00> : vector<8x128xf32>
    %147 = tpu.matmul %146, %13, %cst_50 {dimension_numbers = #tpu.dot_dimension_numbers<[1], [0], [0], [1], [0, 0, 1, 1], [], []>} : vector<8x64xf32>, vector<64x128xf32>, vector<8x128xf32> -> vector<8x128xf32>
    %148 = arith.addf %147, %16 : vector<8x128xf32>
    %149 = arith.negf %148 : vector<8x128xf32>
    %150 = math.exp %149 : vector<8x128xf32>
    %cst_51 = arith.constant 1.000000e+00 : f32
    %151 = vector.broadcast %cst_51 : f32 to vector<8x128xf32>
    %152 = arith.addf %151, %150 : vector<8x128xf32>
    %153 = arith.divf %151, %152 : vector<8x128xf32>
    %cst_52 = arith.constant 2.000000e+00 : f32
    %154 = vector.broadcast %cst_52 : f32 to vector<8x128xf32>
    %155 = arith.mulf %154, %153 : vector<8x128xf32>
    %cst_53 = arith.constant 1.000000e+00 : f32
    %156 = vector.broadcast %cst_53 : f32 to vector<8x128xf32>
    %157 = arith.subf %155, %156 : vector<8x128xf32>
    %158 = arith.select %22, %157, %153 : vector<8x128xi1>, vector<8x128xf32>
    %159 = vector.extract_strided_slice %158 {offsets = [0, 32], sizes = [8, 32], strides = [1, 1]} : vector<8x128xf32> to vector<8x32xf32>
    %160 = arith.mulf %159, %117 : vector<8x32xf32>
    %161 = vector.extract_strided_slice %158 {offsets = [0, 0], sizes = [8, 32], strides = [1, 1]} : vector<8x128xf32> to vector<8x32xf32>
    %162 = vector.extract_strided_slice %158 {offsets = [0, 64], sizes = [8, 32], strides = [1, 1]} : vector<8x128xf32> to vector<8x32xf32>
    %163 = arith.mulf %161, %162 : vector<8x32xf32>
    %164 = arith.addf %160, %163 : vector<8x32xf32>
    %165 = vector.extract_strided_slice %158 {offsets = [0, 96], sizes = [8, 32], strides = [1, 1]} : vector<8x128xf32> to vector<8x32xf32>
    %166 = math.tanh %164 : vector<8x32xf32>
    %167 = arith.mulf %165, %166 : vector<8x32xf32>
    %c3_i32 = arith.constant 3 : i32
    %c8_i32_54 = arith.constant 8 : i32
    %168 = arith.muli %c3_i32, %c8_i32_54 : i32
    %169 = tpu.assume_multiple %168, 8 : i32
    %170 = arith.index_cast %169 : i32 to index
    %c0_55 = arith.constant 0 : index
    %171 = vector.load %arg15[%170, %c0_55] : memref<64x128xf32, #tpu.memory_space<vmem>>, vector<8x128xf32>
    %cst_56 = arith.constant dense<0.000000e+00> : vector<8x128xf32>
    %172 = tpu.matmul %145, %12, %cst_56 {dimension_numbers = #tpu.dot_dimension_numbers<[1], [0], [0], [1], [0, 0, 1, 1], [], []>} : vector<8x32xf32>, vector<32x128xf32>, vector<8x128xf32> -> vector<8x128xf32>
    %173 = arith.addf %171, %172 : vector<8x128xf32>
    %174 = arith.negf %173 : vector<8x128xf32>
    %175 = math.exp %174 : vector<8x128xf32>
    %cst_57 = arith.constant 1.000000e+00 : f32
    %176 = vector.broadcast %cst_57 : f32 to vector<8x128xf32>
    %177 = arith.addf %176, %175 : vector<8x128xf32>
    %178 = arith.divf %176, %177 : vector<8x128xf32>
    %cst_58 = arith.constant 2.000000e+00 : f32
    %179 = vector.broadcast %cst_58 : f32 to vector<8x128xf32>
    %180 = arith.mulf %179, %178 : vector<8x128xf32>
    %cst_59 = arith.constant 1.000000e+00 : f32
    %181 = vector.broadcast %cst_59 : f32 to vector<8x128xf32>
    %182 = arith.subf %180, %181 : vector<8x128xf32>
    %183 = arith.select %22, %182, %178 : vector<8x128xi1>, vector<8x128xf32>
    %184 = vector.extract_strided_slice %183 {offsets = [0, 32], sizes = [8, 32], strides = [1, 1]} : vector<8x128xf32> to vector<8x32xf32>
    %185 = arith.mulf %184, %142 : vector<8x32xf32>
    %186 = vector.extract_strided_slice %183 {offsets = [0, 0], sizes = [8, 32], strides = [1, 1]} : vector<8x128xf32> to vector<8x32xf32>
    %187 = vector.extract_strided_slice %183 {offsets = [0, 64], sizes = [8, 32], strides = [1, 1]} : vector<8x128xf32> to vector<8x32xf32>
    %188 = arith.mulf %186, %187 : vector<8x32xf32>
    %189 = arith.addf %185, %188 : vector<8x32xf32>
    %190 = vector.extract_strided_slice %183 {offsets = [0, 96], sizes = [8, 32], strides = [1, 1]} : vector<8x128xf32> to vector<8x32xf32>
    %191 = math.tanh %189 : vector<8x32xf32>
    %192 = arith.mulf %190, %191 : vector<8x32xf32>
    %193 = tpu.concatenate %192, %167 in 1 : vector<8x32xf32>, vector<8x32xf32> -> vector<8x64xf32>
    %cst_60 = arith.constant dense<0.000000e+00> : vector<8x128xf32>
    %194 = tpu.matmul %193, %13, %cst_60 {dimension_numbers = #tpu.dot_dimension_numbers<[1], [0], [0], [1], [0, 0, 1, 1], [], []>} : vector<8x64xf32>, vector<64x128xf32>, vector<8x128xf32> -> vector<8x128xf32>
    %195 = arith.addf %194, %16 : vector<8x128xf32>
    %196 = arith.negf %195 : vector<8x128xf32>
    %197 = math.exp %196 : vector<8x128xf32>
    %cst_61 = arith.constant 1.000000e+00 : f32
    %198 = vector.broadcast %cst_61 : f32 to vector<8x128xf32>
    %199 = arith.addf %198, %197 : vector<8x128xf32>
    %200 = arith.divf %198, %199 : vector<8x128xf32>
    %cst_62 = arith.constant 2.000000e+00 : f32
    %201 = vector.broadcast %cst_62 : f32 to vector<8x128xf32>
    %202 = arith.mulf %201, %200 : vector<8x128xf32>
    %cst_63 = arith.constant 1.000000e+00 : f32
    %203 = vector.broadcast %cst_63 : f32 to vector<8x128xf32>
    %204 = arith.subf %202, %203 : vector<8x128xf32>
    %205 = arith.select %22, %204, %200 : vector<8x128xi1>, vector<8x128xf32>
    %206 = vector.extract_strided_slice %205 {offsets = [0, 32], sizes = [8, 32], strides = [1, 1]} : vector<8x128xf32> to vector<8x32xf32>
    %207 = arith.mulf %206, %164 : vector<8x32xf32>
    %208 = vector.extract_strided_slice %205 {offsets = [0, 0], sizes = [8, 32], strides = [1, 1]} : vector<8x128xf32> to vector<8x32xf32>
    %209 = vector.extract_strided_slice %205 {offsets = [0, 64], sizes = [8, 32], strides = [1, 1]} : vector<8x128xf32> to vector<8x32xf32>
    %210 = arith.mulf %208, %209 : vector<8x32xf32>
    %211 = arith.addf %207, %210 : vector<8x32xf32>
    %212 = vector.extract_strided_slice %205 {offsets = [0, 96], sizes = [8, 32], strides = [1, 1]} : vector<8x128xf32> to vector<8x32xf32>
    %213 = math.tanh %211 : vector<8x32xf32>
    %214 = arith.mulf %212, %213 : vector<8x32xf32>
    %c4_i32 = arith.constant 4 : i32
    %c8_i32_64 = arith.constant 8 : i32
    %215 = arith.muli %c4_i32, %c8_i32_64 : i32
    %216 = tpu.assume_multiple %215, 8 : i32
    %217 = arith.index_cast %216 : i32 to index
    %c0_65 = arith.constant 0 : index
    %218 = vector.load %arg15[%217, %c0_65] : memref<64x128xf32, #tpu.memory_space<vmem>>, vector<8x128xf32>
    %cst_66 = arith.constant dense<0.000000e+00> : vector<8x128xf32>
    %219 = tpu.matmul %192, %12, %cst_66 {dimension_numbers = #tpu.dot_dimension_numbers<[1], [0], [0], [1], [0, 0, 1, 1], [], []>} : vector<8x32xf32>, vector<32x128xf32>, vector<8x128xf32> -> vector<8x128xf32>
    %220 = arith.addf %218, %219 : vector<8x128xf32>
    %221 = arith.negf %220 : vector<8x128xf32>
    %222 = math.exp %221 : vector<8x128xf32>
    %cst_67 = arith.constant 1.000000e+00 : f32
    %223 = vector.broadcast %cst_67 : f32 to vector<8x128xf32>
    %224 = arith.addf %223, %222 : vector<8x128xf32>
    %225 = arith.divf %223, %224 : vector<8x128xf32>
    %cst_68 = arith.constant 2.000000e+00 : f32
    %226 = vector.broadcast %cst_68 : f32 to vector<8x128xf32>
    %227 = arith.mulf %226, %225 : vector<8x128xf32>
    %cst_69 = arith.constant 1.000000e+00 : f32
    %228 = vector.broadcast %cst_69 : f32 to vector<8x128xf32>
    %229 = arith.subf %227, %228 : vector<8x128xf32>
    %230 = arith.select %22, %229, %225 : vector<8x128xi1>, vector<8x128xf32>
    %231 = vector.extract_strided_slice %230 {offsets = [0, 32], sizes = [8, 32], strides = [1, 1]} : vector<8x128xf32> to vector<8x32xf32>
    %232 = arith.mulf %231, %189 : vector<8x32xf32>
    %233 = vector.extract_strided_slice %230 {offsets = [0, 0], sizes = [8, 32], strides = [1, 1]} : vector<8x128xf32> to vector<8x32xf32>
    %234 = vector.extract_strided_slice %230 {offsets = [0, 64], sizes = [8, 32], strides = [1, 1]} : vector<8x128xf32> to vector<8x32xf32>
    %235 = arith.mulf %233, %234 : vector<8x32xf32>
    %236 = arith.addf %232, %235 : vector<8x32xf32>
    %237 = vector.extract_strided_slice %230 {offsets = [0, 96], sizes = [8, 32], strides = [1, 1]} : vector<8x128xf32> to vector<8x32xf32>
    %238 = math.tanh %236 : vector<8x32xf32>
    %239 = arith.mulf %237, %238 : vector<8x32xf32>
    %240 = tpu.concatenate %239, %214 in 1 : vector<8x32xf32>, vector<8x32xf32> -> vector<8x64xf32>
    %cst_70 = arith.constant dense<0.000000e+00> : vector<8x128xf32>
    %241 = tpu.matmul %240, %13, %cst_70 {dimension_numbers = #tpu.dot_dimension_numbers<[1], [0], [0], [1], [0, 0, 1, 1], [], []>} : vector<8x64xf32>, vector<64x128xf32>, vector<8x128xf32> -> vector<8x128xf32>
    %242 = arith.addf %241, %16 : vector<8x128xf32>
    %243 = arith.negf %242 : vector<8x128xf32>
    %244 = math.exp %243 : vector<8x128xf32>
    %cst_71 = arith.constant 1.000000e+00 : f32
    %245 = vector.broadcast %cst_71 : f32 to vector<8x128xf32>
    %246 = arith.addf %245, %244 : vector<8x128xf32>
    %247 = arith.divf %245, %246 : vector<8x128xf32>
    %cst_72 = arith.constant 2.000000e+00 : f32
    %248 = vector.broadcast %cst_72 : f32 to vector<8x128xf32>
    %249 = arith.mulf %248, %247 : vector<8x128xf32>
    %cst_73 = arith.constant 1.000000e+00 : f32
    %250 = vector.broadcast %cst_73 : f32 to vector<8x128xf32>
    %251 = arith.subf %249, %250 : vector<8x128xf32>
    %252 = arith.select %22, %251, %247 : vector<8x128xi1>, vector<8x128xf32>
    %253 = vector.extract_strided_slice %252 {offsets = [0, 32], sizes = [8, 32], strides = [1, 1]} : vector<8x128xf32> to vector<8x32xf32>
    %254 = arith.mulf %253, %211 : vector<8x32xf32>
    %255 = vector.extract_strided_slice %252 {offsets = [0, 0], sizes = [8, 32], strides = [1, 1]} : vector<8x128xf32> to vector<8x32xf32>
    %256 = vector.extract_strided_slice %252 {offsets = [0, 64], sizes = [8, 32], strides = [1, 1]} : vector<8x128xf32> to vector<8x32xf32>
    %257 = arith.mulf %255, %256 : vector<8x32xf32>
    %258 = arith.addf %254, %257 : vector<8x32xf32>
    %259 = vector.extract_strided_slice %252 {offsets = [0, 96], sizes = [8, 32], strides = [1, 1]} : vector<8x128xf32> to vector<8x32xf32>
    %260 = math.tanh %258 : vector<8x32xf32>
    %261 = arith.mulf %259, %260 : vector<8x32xf32>
    %c5_i32 = arith.constant 5 : i32
    %c8_i32_74 = arith.constant 8 : i32
    %262 = arith.muli %c5_i32, %c8_i32_74 : i32
    %263 = tpu.assume_multiple %262, 8 : i32
    %264 = arith.index_cast %263 : i32 to index
    %c0_75 = arith.constant 0 : index
    %265 = vector.load %arg15[%264, %c0_75] : memref<64x128xf32, #tpu.memory_space<vmem>>, vector<8x128xf32>
    %cst_76 = arith.constant dense<0.000000e+00> : vector<8x128xf32>
    %266 = tpu.matmul %239, %12, %cst_76 {dimension_numbers = #tpu.dot_dimension_numbers<[1], [0], [0], [1], [0, 0, 1, 1], [], []>} : vector<8x32xf32>, vector<32x128xf32>, vector<8x128xf32> -> vector<8x128xf32>
    %267 = arith.addf %265, %266 : vector<8x128xf32>
    %268 = arith.negf %267 : vector<8x128xf32>
    %269 = math.exp %268 : vector<8x128xf32>
    %cst_77 = arith.constant 1.000000e+00 : f32
    %270 = vector.broadcast %cst_77 : f32 to vector<8x128xf32>
    %271 = arith.addf %270, %269 : vector<8x128xf32>
    %272 = arith.divf %270, %271 : vector<8x128xf32>
    %cst_78 = arith.constant 2.000000e+00 : f32
    %273 = vector.broadcast %cst_78 : f32 to vector<8x128xf32>
    %274 = arith.mulf %273, %272 : vector<8x128xf32>
    %cst_79 = arith.constant 1.000000e+00 : f32
    %275 = vector.broadcast %cst_79 : f32 to vector<8x128xf32>
    %276 = arith.subf %274, %275 : vector<8x128xf32>
    %277 = arith.select %22, %276, %272 : vector<8x128xi1>, vector<8x128xf32>
    %278 = vector.extract_strided_slice %277 {offsets = [0, 32], sizes = [8, 32], strides = [1, 1]} : vector<8x128xf32> to vector<8x32xf32>
    %279 = arith.mulf %278, %236 : vector<8x32xf32>
    %280 = vector.extract_strided_slice %277 {offsets = [0, 0], sizes = [8, 32], strides = [1, 1]} : vector<8x128xf32> to vector<8x32xf32>
    %281 = vector.extract_strided_slice %277 {offsets = [0, 64], sizes = [8, 32], strides = [1, 1]} : vector<8x128xf32> to vector<8x32xf32>
    %282 = arith.mulf %280, %281 : vector<8x32xf32>
    %283 = arith.addf %279, %282 : vector<8x32xf32>
    %284 = vector.extract_strided_slice %277 {offsets = [0, 96], sizes = [8, 32], strides = [1, 1]} : vector<8x128xf32> to vector<8x32xf32>
    %285 = math.tanh %283 : vector<8x32xf32>
    %286 = arith.mulf %284, %285 : vector<8x32xf32>
    %287 = tpu.concatenate %286, %261 in 1 : vector<8x32xf32>, vector<8x32xf32> -> vector<8x64xf32>
    %cst_80 = arith.constant dense<0.000000e+00> : vector<8x128xf32>
    %288 = tpu.matmul %287, %13, %cst_80 {dimension_numbers = #tpu.dot_dimension_numbers<[1], [0], [0], [1], [0, 0, 1, 1], [], []>} : vector<8x64xf32>, vector<64x128xf32>, vector<8x128xf32> -> vector<8x128xf32>
    %289 = arith.addf %288, %16 : vector<8x128xf32>
    %290 = arith.negf %289 : vector<8x128xf32>
    %291 = math.exp %290 : vector<8x128xf32>
    %cst_81 = arith.constant 1.000000e+00 : f32
    %292 = vector.broadcast %cst_81 : f32 to vector<8x128xf32>
    %293 = arith.addf %292, %291 : vector<8x128xf32>
    %294 = arith.divf %292, %293 : vector<8x128xf32>
    %cst_82 = arith.constant 2.000000e+00 : f32
    %295 = vector.broadcast %cst_82 : f32 to vector<8x128xf32>
    %296 = arith.mulf %295, %294 : vector<8x128xf32>
    %cst_83 = arith.constant 1.000000e+00 : f32
    %297 = vector.broadcast %cst_83 : f32 to vector<8x128xf32>
    %298 = arith.subf %296, %297 : vector<8x128xf32>
    %299 = arith.select %22, %298, %294 : vector<8x128xi1>, vector<8x128xf32>
    %300 = vector.extract_strided_slice %299 {offsets = [0, 32], sizes = [8, 32], strides = [1, 1]} : vector<8x128xf32> to vector<8x32xf32>
    %301 = arith.mulf %300, %258 : vector<8x32xf32>
    %302 = vector.extract_strided_slice %299 {offsets = [0, 0], sizes = [8, 32], strides = [1, 1]} : vector<8x128xf32> to vector<8x32xf32>
    %303 = vector.extract_strided_slice %299 {offsets = [0, 64], sizes = [8, 32], strides = [1, 1]} : vector<8x128xf32> to vector<8x32xf32>
    %304 = arith.mulf %302, %303 : vector<8x32xf32>
    %305 = arith.addf %301, %304 : vector<8x32xf32>
    %306 = vector.extract_strided_slice %299 {offsets = [0, 96], sizes = [8, 32], strides = [1, 1]} : vector<8x128xf32> to vector<8x32xf32>
    %307 = math.tanh %305 : vector<8x32xf32>
    %308 = arith.mulf %306, %307 : vector<8x32xf32>
    %c6_i32 = arith.constant 6 : i32
    %c8_i32_84 = arith.constant 8 : i32
    %309 = arith.muli %c6_i32, %c8_i32_84 : i32
    %310 = tpu.assume_multiple %309, 8 : i32
    %311 = arith.index_cast %310 : i32 to index
    %c0_85 = arith.constant 0 : index
    %312 = vector.load %arg15[%311, %c0_85] : memref<64x128xf32, #tpu.memory_space<vmem>>, vector<8x128xf32>
    %cst_86 = arith.constant dense<0.000000e+00> : vector<8x128xf32>
    %313 = tpu.matmul %286, %12, %cst_86 {dimension_numbers = #tpu.dot_dimension_numbers<[1], [0], [0], [1], [0, 0, 1, 1], [], []>} : vector<8x32xf32>, vector<32x128xf32>, vector<8x128xf32> -> vector<8x128xf32>
    %314 = arith.addf %312, %313 : vector<8x128xf32>
    %315 = arith.negf %314 : vector<8x128xf32>
    %316 = math.exp %315 : vector<8x128xf32>
    %cst_87 = arith.constant 1.000000e+00 : f32
    %317 = vector.broadcast %cst_87 : f32 to vector<8x128xf32>
    %318 = arith.addf %317, %316 : vector<8x128xf32>
    %319 = arith.divf %317, %318 : vector<8x128xf32>
    %cst_88 = arith.constant 2.000000e+00 : f32
    %320 = vector.broadcast %cst_88 : f32 to vector<8x128xf32>
    %321 = arith.mulf %320, %319 : vector<8x128xf32>
    %cst_89 = arith.constant 1.000000e+00 : f32
    %322 = vector.broadcast %cst_89 : f32 to vector<8x128xf32>
    %323 = arith.subf %321, %322 : vector<8x128xf32>
    %324 = arith.select %22, %323, %319 : vector<8x128xi1>, vector<8x128xf32>
    %325 = vector.extract_strided_slice %324 {offsets = [0, 32], sizes = [8, 32], strides = [1, 1]} : vector<8x128xf32> to vector<8x32xf32>
    %326 = arith.mulf %325, %283 : vector<8x32xf32>
    %327 = vector.extract_strided_slice %324 {offsets = [0, 0], sizes = [8, 32], strides = [1, 1]} : vector<8x128xf32> to vector<8x32xf32>
    %328 = vector.extract_strided_slice %324 {offsets = [0, 64], sizes = [8, 32], strides = [1, 1]} : vector<8x128xf32> to vector<8x32xf32>
    %329 = arith.mulf %327, %328 : vector<8x32xf32>
    %330 = arith.addf %326, %329 : vector<8x32xf32>
    %331 = vector.extract_strided_slice %324 {offsets = [0, 96], sizes = [8, 32], strides = [1, 1]} : vector<8x128xf32> to vector<8x32xf32>
    %332 = math.tanh %330 : vector<8x32xf32>
    %333 = arith.mulf %331, %332 : vector<8x32xf32>
    %334 = tpu.concatenate %333, %308 in 1 : vector<8x32xf32>, vector<8x32xf32> -> vector<8x64xf32>
    %cst_90 = arith.constant dense<0.000000e+00> : vector<8x128xf32>
    %335 = tpu.matmul %334, %13, %cst_90 {dimension_numbers = #tpu.dot_dimension_numbers<[1], [0], [0], [1], [0, 0, 1, 1], [], []>} : vector<8x64xf32>, vector<64x128xf32>, vector<8x128xf32> -> vector<8x128xf32>
    %336 = arith.addf %335, %16 : vector<8x128xf32>
    %337 = arith.negf %336 : vector<8x128xf32>
    %338 = math.exp %337 : vector<8x128xf32>
    %cst_91 = arith.constant 1.000000e+00 : f32
    %339 = vector.broadcast %cst_91 : f32 to vector<8x128xf32>
    %340 = arith.addf %339, %338 : vector<8x128xf32>
    %341 = arith.divf %339, %340 : vector<8x128xf32>
    %cst_92 = arith.constant 2.000000e+00 : f32
    %342 = vector.broadcast %cst_92 : f32 to vector<8x128xf32>
    %343 = arith.mulf %342, %341 : vector<8x128xf32>
    %cst_93 = arith.constant 1.000000e+00 : f32
    %344 = vector.broadcast %cst_93 : f32 to vector<8x128xf32>
    %345 = arith.subf %343, %344 : vector<8x128xf32>
    %346 = arith.select %22, %345, %341 : vector<8x128xi1>, vector<8x128xf32>
    %347 = vector.extract_strided_slice %346 {offsets = [0, 32], sizes = [8, 32], strides = [1, 1]} : vector<8x128xf32> to vector<8x32xf32>
    %348 = arith.mulf %347, %305 : vector<8x32xf32>
    %349 = vector.extract_strided_slice %346 {offsets = [0, 0], sizes = [8, 32], strides = [1, 1]} : vector<8x128xf32> to vector<8x32xf32>
    %350 = vector.extract_strided_slice %346 {offsets = [0, 64], sizes = [8, 32], strides = [1, 1]} : vector<8x128xf32> to vector<8x32xf32>
    %351 = arith.mulf %349, %350 : vector<8x32xf32>
    %352 = arith.addf %348, %351 : vector<8x32xf32>
    %353 = vector.extract_strided_slice %346 {offsets = [0, 96], sizes = [8, 32], strides = [1, 1]} : vector<8x128xf32> to vector<8x32xf32>
    %354 = math.tanh %352 : vector<8x32xf32>
    %355 = arith.mulf %353, %354 : vector<8x32xf32>
    %c7_i32 = arith.constant 7 : i32
    %c8_i32_94 = arith.constant 8 : i32
    %356 = arith.muli %c7_i32, %c8_i32_94 : i32
    %357 = tpu.assume_multiple %356, 8 : i32
    %358 = arith.index_cast %357 : i32 to index
    %c0_95 = arith.constant 0 : index
    %359 = vector.load %arg15[%358, %c0_95] : memref<64x128xf32, #tpu.memory_space<vmem>>, vector<8x128xf32>
    %cst_96 = arith.constant dense<0.000000e+00> : vector<8x128xf32>
    %360 = tpu.matmul %333, %12, %cst_96 {dimension_numbers = #tpu.dot_dimension_numbers<[1], [0], [0], [1], [0, 0, 1, 1], [], []>} : vector<8x32xf32>, vector<32x128xf32>, vector<8x128xf32> -> vector<8x128xf32>
    %361 = arith.addf %359, %360 : vector<8x128xf32>
    %362 = arith.negf %361 : vector<8x128xf32>
    %363 = math.exp %362 : vector<8x128xf32>
    %cst_97 = arith.constant 1.000000e+00 : f32
    %364 = vector.broadcast %cst_97 : f32 to vector<8x128xf32>
    %365 = arith.addf %364, %363 : vector<8x128xf32>
    %366 = arith.divf %364, %365 : vector<8x128xf32>
    %cst_98 = arith.constant 2.000000e+00 : f32
    %367 = vector.broadcast %cst_98 : f32 to vector<8x128xf32>
    %368 = arith.mulf %367, %366 : vector<8x128xf32>
    %cst_99 = arith.constant 1.000000e+00 : f32
    %369 = vector.broadcast %cst_99 : f32 to vector<8x128xf32>
    %370 = arith.subf %368, %369 : vector<8x128xf32>
    %371 = arith.select %22, %370, %366 : vector<8x128xi1>, vector<8x128xf32>
    %372 = vector.extract_strided_slice %371 {offsets = [0, 32], sizes = [8, 32], strides = [1, 1]} : vector<8x128xf32> to vector<8x32xf32>
    %373 = arith.mulf %372, %330 : vector<8x32xf32>
    %374 = vector.extract_strided_slice %371 {offsets = [0, 0], sizes = [8, 32], strides = [1, 1]} : vector<8x128xf32> to vector<8x32xf32>
    %375 = vector.extract_strided_slice %371 {offsets = [0, 64], sizes = [8, 32], strides = [1, 1]} : vector<8x128xf32> to vector<8x32xf32>
    %376 = arith.mulf %374, %375 : vector<8x32xf32>
    %377 = arith.addf %373, %376 : vector<8x32xf32>
    %378 = vector.extract_strided_slice %371 {offsets = [0, 96], sizes = [8, 32], strides = [1, 1]} : vector<8x128xf32> to vector<8x32xf32>
    %379 = math.tanh %377 : vector<8x32xf32>
    %380 = arith.mulf %378, %379 : vector<8x32xf32>
    %381 = tpu.concatenate %380, %355 in 1 : vector<8x32xf32>, vector<8x32xf32> -> vector<8x64xf32>
    %cst_100 = arith.constant dense<0.000000e+00> : vector<8x128xf32>
    %382 = tpu.matmul %381, %13, %cst_100 {dimension_numbers = #tpu.dot_dimension_numbers<[1], [0], [0], [1], [0, 0, 1, 1], [], []>} : vector<8x64xf32>, vector<64x128xf32>, vector<8x128xf32> -> vector<8x128xf32>
    %383 = arith.addf %382, %16 : vector<8x128xf32>
    %384 = arith.negf %383 : vector<8x128xf32>
    %385 = math.exp %384 : vector<8x128xf32>
    %cst_101 = arith.constant 1.000000e+00 : f32
    %386 = vector.broadcast %cst_101 : f32 to vector<8x128xf32>
    %387 = arith.addf %386, %385 : vector<8x128xf32>
    %388 = arith.divf %386, %387 : vector<8x128xf32>
    %cst_102 = arith.constant 2.000000e+00 : f32
    %389 = vector.broadcast %cst_102 : f32 to vector<8x128xf32>
    %390 = arith.mulf %389, %388 : vector<8x128xf32>
    %cst_103 = arith.constant 1.000000e+00 : f32
    %391 = vector.broadcast %cst_103 : f32 to vector<8x128xf32>
    %392 = arith.subf %390, %391 : vector<8x128xf32>
    %393 = arith.select %22, %392, %388 : vector<8x128xi1>, vector<8x128xf32>
    %394 = vector.extract_strided_slice %393 {offsets = [0, 32], sizes = [8, 32], strides = [1, 1]} : vector<8x128xf32> to vector<8x32xf32>
    %395 = arith.mulf %394, %352 : vector<8x32xf32>
    %396 = vector.extract_strided_slice %393 {offsets = [0, 0], sizes = [8, 32], strides = [1, 1]} : vector<8x128xf32> to vector<8x32xf32>
    %397 = vector.extract_strided_slice %393 {offsets = [0, 64], sizes = [8, 32], strides = [1, 1]} : vector<8x128xf32> to vector<8x32xf32>
    %398 = arith.mulf %396, %397 : vector<8x32xf32>
    %399 = arith.addf %395, %398 : vector<8x32xf32>
    %400 = vector.extract_strided_slice %393 {offsets = [0, 96], sizes = [8, 32], strides = [1, 1]} : vector<8x128xf32> to vector<8x32xf32>
    %401 = math.tanh %399 : vector<8x32xf32>
    %402 = arith.mulf %400, %401 : vector<8x32xf32>
    %c8_i32_104 = arith.constant 8 : i32
    %c0_105 = arith.constant 0 : index
    %c0_106 = arith.constant 0 : index
    %403 = vector.load %arg11[%c0_105, %c0_106] : memref<8x32xf32, #tpu.memory_space<vmem>>, vector<8x32xf32>
    tpu.vector_store %arg11[%c0_105, %c0_106], %380 {strides = array<i32>} : memref<8x32xf32, #tpu.memory_space<vmem>>, vector<8x32xf32>,
    %c0_107 = arith.constant 0 : index
    %c0_108 = arith.constant 0 : index
    %404 = vector.load %arg12[%c0_107, %c0_108] : memref<8x32xf32, #tpu.memory_space<vmem>>, vector<8x32xf32>
    tpu.vector_store %arg12[%c0_107, %c0_108], %377 {strides = array<i32>} : memref<8x32xf32, #tpu.memory_space<vmem>>, vector<8x32xf32>,
    %c0_109 = arith.constant 0 : index
    %c0_110 = arith.constant 0 : index
    %405 = vector.load %arg13[%c0_109, %c0_110] : memref<8x32xf32, #tpu.memory_space<vmem>>, vector<8x32xf32>
    tpu.vector_store %arg13[%c0_109, %c0_110], %402 {strides = array<i32>} : memref<8x32xf32, #tpu.memory_space<vmem>>, vector<8x32xf32>,
    %c0_111 = arith.constant 0 : index
    %c0_112 = arith.constant 0 : index
    %406 = vector.load %arg14[%c0_111, %c0_112] : memref<8x32xf32, #tpu.memory_space<vmem>>, vector<8x32xf32>
    tpu.vector_store %arg14[%c0_111, %c0_112], %399 {strides = array<i32>} : memref<8x32xf32, #tpu.memory_space<vmem>>, vector<8x32xf32>,
    %407 = arith.extui %1 : i1 to i32
    %c0_i32_113 = arith.constant 0 : i32
    %408 = arith.cmpi ne, %407, %c0_i32_113 : i32
    scf.if %408 {
      %c0_114 = arith.constant 0 : index
      %c0_115 = arith.constant 0 : index
      %409 = vector.load %arg8[%c0_114, %c0_115] : memref<32x128xf32, #tpu.memory_space<vmem>>, vector<32x128xf32>
      %cst_116 = arith.constant dense<0.000000e+00> : vector<8x128xf32>
      %410 = tpu.matmul %402, %409, %cst_116 {dimension_numbers = #tpu.dot_dimension_numbers<[1], [0], [0], [1], [0, 0, 1, 1], [], []>} : vector<8x32xf32>, vector<32x128xf32>, vector<8x128xf32> -> vector<8x128xf32>
      %c0_117 = arith.constant 0 : index
      %c0_118 = arith.constant 0 : index
      %411 = vector.load %arg9[%c0_117, %c0_118] : memref<1x128xf32, #tpu.memory_space<vmem>>, vector<1x128xf32>
      %412 = vector.broadcast %411 : vector<1x128xf32> to vector<8x128xf32>
      %413 = arith.addf %410, %412 : vector<8x128xf32>
      %c0_119 = arith.constant 0 : index
      %c0_120 = arith.constant 0 : index
      %414 = vector.load %arg10[%c0_119, %c0_120] : memref<8x128xf32, #tpu.memory_space<vmem>>, vector<8x128xf32>
      tpu.vector_store %arg10[%c0_119, %c0_120], %413 {strides = array<i32>} : memref<8x128xf32, #tpu.memory_space<vmem>>, vector<8x128xf32>,
    } else {
    }
    return
  }
  func.func @transform_0(%arg0: i32, %arg1: i32) -> (i32, i32, i32) {
    %c0_i32 = arith.constant 0 : i32
    %c0_i32_0 = arith.constant 0 : i32
    return %arg0, %arg1, %c0_i32 : i32, i32, i32
  }
  func.func @transform_1(%arg0: i32, %arg1: i32) -> (i32, i32) {
    %c0_i32 = arith.constant 0 : i32
    %c0_i32_0 = arith.constant 0 : i32
    %c0_i32_1 = arith.constant 0 : i32
    return %c0_i32, %c0_i32_0 : i32, i32
  }
  func.func @transform_2(%arg0: i32, %arg1: i32) -> (i32, i32) {
    %c0_i32 = arith.constant 0 : i32
    %c0_i32_0 = arith.constant 0 : i32
    %c0_i32_1 = arith.constant 0 : i32
    return %c0_i32, %c0_i32_0 : i32, i32
  }
  func.func @transform_3(%arg0: i32, %arg1: i32) -> (i32, i32) {
    %c0_i32 = arith.constant 0 : i32
    %c0_i32_0 = arith.constant 0 : i32
    %c0_i32_1 = arith.constant 0 : i32
    return %c0_i32, %c0_i32_0 : i32, i32
  }
  func.func @transform_4(%arg0: i32, %arg1: i32) -> (i32, i32) {
    %c0_i32 = arith.constant 0 : i32
    %c0_i32_0 = arith.constant 0 : i32
    %c0_i32_1 = arith.constant 0 : i32
    return %c0_i32, %c0_i32_0 : i32, i32
  }
  func.func @transform_5(%arg0: i32, %arg1: i32) -> (i32, i32) {
    %c0_i32 = arith.constant 0 : i32
    %c0_i32_0 = arith.constant 0 : i32
    %c0_i32_1 = arith.constant 0 : i32
    return %c0_i32, %c0_i32_0 : i32, i32
  }
  func.func @transform_6(%arg0: i32, %arg1: i32) -> (i32, i32) {
    %c0_i32 = arith.constant 0 : i32
    %c0_i32_0 = arith.constant 0 : i32
    %c0_i32_1 = arith.constant 0 : i32
    return %c0_i32, %c0_i32_0 : i32, i32
  }
  func.func @transform_7(%arg0: i32, %arg1: i32) -> (i32, i32) {
    %c0_i32 = arith.constant 0 : i32
    %c0_i32_0 = arith.constant 0 : i32
    %c0_i32_1 = arith.constant 0 : i32
    return %c0_i32, %c0_i32_0 : i32, i32
  }
  func.func @transform_8(%arg0: i32, %arg1: i32) -> (i32, i32) {
    %c0_i32 = arith.constant 0 : i32
    %c0_i32_0 = arith.constant 0 : i32
    return %arg0, %c0_i32 : i32, i32
  }
}

</mosaic_0001>

<bundles_post_ra>
// kernel: tpu_custom_call.1
= control target key start
LH: loop header
LB: loop body
LE: loop exit
PB: predicated region body
PF: predicated region fallthrough
CT: control target
= control target key end

     0   :  { %13 = vsyncpa [#allocation8], 0  ;;  %s3387_s0 = inlined_call_operand.vmem [shape: f32[1,64,16], index: 0, kind: input, shape index: {}]   ;;  %s3388_s1 = inlined_call_operand.hbm [shape: f32[16,128], index: 1, kind: input, shape index: {}]   ;;  %s3389_s2 = inlined_call_operand.hbm [shape: f32[32,128], index: 2, kind: input, shape index: {}]   ;;  %s3390_s3 = inlined_call_operand.vmem [shape: f32[1,128], index: 3, kind: input, shape index: {}]   ;;  %s3391_s4 = inlined_call_operand.vmem [shape: f32[64,128], index: 4, kind: input, shape index: {}]   ;;  %s3392_s5 = inlined_call_operand.vmem [shape: f32[1,128], index: 5, kind: input, shape index: {}]   ;;  %s3393_s6 = inlined_call_operand.vmem [shape: f32[32,128], index: 6, kind: input, shape index: {}]   ;;  %s3394_s7 = inlined_call_operand.vmem [shape: f32[1,128], index: 7, kind: input, shape index: {}]   ;;  %s3395_s8 = inlined_call_operand.hbm [shape: f32[8,128], index: 8, kind: output, shape index: {}]  }
   0x1   :  { %14 = vsyncpa [#allocation11], 0 }
   0x2   :  { %15 = vsyncpa [#allocation9], 0  ;;  %s2839_s27 = smov [#allocation7]   ;;  %s2767_s9 = scalar_lea.hbm %s3388_s1, 256 }
   0x3   :  { %s23_s28 = sshll.u32 %s2839_s27, 4  ;;  %p2768_p0 = scmp.ne.s32.totalorder %s3388_s1, %s2767_s9  ;;  %s24_s28 = int_to_ptr.vmem [resolvable:$true] %s23_s28 }
   0x4   :  { %p2771_p1 = scmp.lt.u32.totalorder %s2767_s9, %s3388_s1 }
   0x6   :  { %p2773_p2 = pnand %p2771_p1, %p2768_p0 }
   0x8   :  { %2776 = shalt.err (!%p2773_p2)
}
   0x9   :  { %s2777_s14 = scalar_lea.vmem %s24_s28, 256  ;;  %p2782_p4 = scmp.lt.s32.totalorder %s24_s28, %s24_s28 }
   0xa   :  { %p2778_p3 = scmp.ne.s32.totalorder %s24_s28, %s2777_s14  ;;  %p2783_p5 = scmp.lt.s32.totalorder %s2777_s14, %s2777_s14 }
   0xc   :  { %p2784_p6 = por %p2783_p5, %p2782_p4 }
   0xe   :  { %p2785_p7 = pnand %p2784_p6, %p2778_p3 }
  0x10   :  { %2788 = shalt.err (!%p2785_p7)
}
  0x11   :  { %s2840_s15 = smov 128   ;;  %s2841_s16 = smov 8  }
  0x12   :  { %29 = dma.hbm_to_vmem [thread:$0]  %s3388_s1, 256, %s24_s28, [#allocation8], %s2840_s15, %s2840_s15, %s2841_s16  }
  0x13   :  { %s2842_s19 = smov [#allocation10]   ;;  %s2789_s23 = scalar_lea.hbm %s3389_s2, 512 }
  0x14   :  { %s35_s20 = sshll.u32 %s2842_s19, 4  ;;  %p2790_p8 = scmp.ne.s32.totalorder %s3389_s2, %s2789_s23  ;;  %s36_s20 = int_to_ptr.vmem [resolvable:$true] %s35_s20 }
  0x15   :  { %p2793_p9 = scmp.lt.u32.totalorder %s2789_s23, %s3389_s2 }
  0x17   :  { %p2795_p10 = pnand %p2793_p9, %p2790_p8 }
  0x19   :  { %2798 = shalt.err (!%p2795_p10)
}
  0x1a   :  { %s2799_s29 = scalar_lea.vmem %s36_s20, 512  ;;  %p2804_p12 = scmp.lt.s32.totalorder %s36_s20, %s36_s20 }
  0x1b   :  { %p2800_p11 = scmp.ne.s32.totalorder %s36_s20, %s2799_s29  ;;  %p2805_p13 = scmp.lt.s32.totalorder %s2799_s29, %s2799_s29 }
  0x1d   :  { %p2806_p0 = por %p2805_p13, %p2804_p12 }
  0x1f   :  { %p2807_p1 = pnand %p2806_p0, %p2800_p11 }
  0x21   :  { %2810 = shalt.err (!%p2807_p1)
}
  0x22   :  { %41 = dma.hbm_to_vmem [thread:$0]  %s3389_s2, 512, %s36_s20, [#allocation11], %s2840_s15, %s2840_s15, %s2841_s16  }
  0x23   :  { %2833 = dma.done.wait [#allocation8], 256  }
  0x24   :  { %2834 = vsyncadd [#allocation8], 4294967040 }
  0x25   :  { %2835 = dma.done.wait [#allocation11], 512  }
  0x26   :  { %2836 = vsyncadd [#allocation11], 4294966784  ;;  %v2843_v0 = vmov 0.0|0.0   ;;  %vm2844_vm0 = vmmov 0   ;;  %v2845_v1 = vmov 0.0   ;;  %vm62_vm1 = vcmask 261120  }
  0x27   :  { %2509 = vmatprep.subr.bf16.mxu1 %v2843_v0  ;;  %2262 = vmatprep.mubr.msk.f32.mxu1 %vm2844_vm0, %v2845_v1  ;;  %63 = vst.msk [vmem:[#allocation2] sm:$0xff] %vm62_vm1, %v2845_v1  ;;  %64 = vst.msk [vmem:[#allocation3] sm:$0xff] %vm62_vm1, %v2845_v1  ;;  %vm84_vm2 = vcmask 130048   ;;  %v75_v2 = vld [vmem:[#allocation7] sm:$0xff]  ;;  %v76_v3 = vld [vmem:[#allocation7 + $0x8] sm:$0xff]  ;;  %v241_v24 = vlaneseq  ;;  %s2846_s13 = smov 64  }
  0x28   :  { %65 = vst.msk [vmem:[#allocation4] sm:$0xff] %vm62_vm1, %v2845_v1  ;;  %66 = vst.msk [vmem:[#allocation5] sm:$0xff] %vm62_vm1, %v2845_v1  ;;  %v222_v4 = vld [vmem:[#allocation10] sm:$0xff]  ;;  %v2505_v5 = vpack.c.bf16 %v76_v3, %v75_v2  ;;  %v223_v6 = vld [vmem:[#allocation10 + $0x8] sm:$0xff]  ;;  %s2847_s14 = smov 32   ;;  %vm365_vm6 = vcmask 523264  }
  0x29   :  { %v67_v7 = vld [vmem:[%s3387_s0] sm:$0xff]  ;;  %v2933_v8 = vpack.c.bf16 %v223_v6, %v222_v4  ;;  %v225_v10 = vld [vmem:[#allocation10 + $0x18] sm:$0xff]  ;;  %v242_v25 = vand.u32 127, %v241_v24  ;;  %v69_v40 = vld [vmem:[%s3387_s0 + $0x10] sm:$0xff]  ;;  %s2848_s1 = smov 96   ;;  %s2849_s28 = smov [#allocation12]  }
  0x2a   :  { %2242 = vmatprep.mubr.msk.f32.mxu0 %vm84_vm2, %v67_v7  ;;  %v224_v9 = vld [vmem:[#allocation10 + $0x10] sm:$0xff]  ;;  %2506 = vmatprep.subr.bf16.mxu0 %v2505_v5  ;;  %v68_v11 = vld [vmem:[%s3387_s0 + $0x8] sm:$0xff]  ;;  %v70_v42 = vld [vmem:[%s3387_s0 + $0x18] sm:$0xff]  ;;  %s2041_s2 = sshll.u32 %s2849_s28, 4  ;;  %s2042_s2 = int_to_ptr.vmem [resolvable:$true] %s2041_s2 }
  0x2b   :  { %2511 = vmatpush3.bf16.msra.mxu1 %v2933_v8  ;;  %2508 = vmatpush3.bf16.msra.mxu0 %v2505_v5  ;;  %v2940_v12 = vpack.c.bf16 %v225_v10, %v224_v9  ;;  %v2957_v14 = vld [vmem:[%s3390_s3] ss:$0 sm:$0xff]  ;;  %vm243_vm3 = vcmp.ge.s32.totalorder %v242_v25, 64  ;;  %vm244_vm4 = vcmp.lt.s32.totalorder %v242_v25, 96  ;;  %v227_v39 = vld [vmem:[%s3391_s4 + $0x8] sm:$0xff]  ;;  %v228_v43 = vld [vmem:[%s3391_s4 + $0x10] sm:$0xff]  ;;  %p2816_p3 = scmp.lt.s32.totalorder %s2042_s2, %s2042_s2 }
  0x2c   :  { %2512 = vmatprep.subr.bf16.mxu1 %v2843_v0  ;;  %2515 = vmatprep.subr.bf16.mxu0 %v2843_v0  ;;  %vm2962_vm5 = vmand %vm243_vm3, %vm244_vm4  ;;  %v226_v38 = vld [vmem:[%s3391_s4] sm:$0xff]  ;;  %v229_v44 = vld [vmem:[%s3391_s4 + $0x18] sm:$0xff] }
  0x2d   :  { %v2983_v41 = vpack.c.bf16 %v227_v39, %v226_v38  ;;  %v71_v45 = vld [vmem:[%s3387_s0 + $0x20] sm:$0xff]  ;;  %v3000_v46 = vpack.c.bf16 %v229_v44, %v228_v43  ;;  %v72_v47 = vld [vmem:[%s3387_s0 + $0x28] sm:$0xff]  ;;  %v73_v50 = vld [vmem:[%s3387_s0 + $0x30] sm:$0xff] }
  0x2e   :  { %2243 = vmatmul.mubr.msk.f32.vlgmr.msra.gmra.mrb[0].mxu0 %vm84_vm2, %v68_v11  ;;  %v246_v13 = vld [vmem:[#allocation2] sm:$0xff]  ;;  %v247_v31 = vld [vmem:[#allocation3] sm:$0xff]  ;;  %v74_v52 = vld [vmem:[%s3387_s0 + $0x38] sm:$0xff] }
  0x2f   :  { %2514 = vmatpush3.bf16.msra.mxu1 %v2940_v12  ;;  %2245 = vmatprep.mubr.msk.f32.mxu0 %vm84_vm2, %v69_v40  ;;  %v230_v48 = vld [vmem:[%s3391_s4 + $0x20] sm:$0xff]  ;;  %v231_v49 = vld [vmem:[%s3391_s4 + $0x28] sm:$0xff]  ;;  %v232_v53 = vld [vmem:[%s3391_s4 + $0x30] sm:$0xff] }
  0x30   :  { %2527 = vmatprep.subr.bf16.mxu1 %v2843_v0  ;;  %2517 = vmatpush3.bf16.msra.mxu0 %v2983_v41  ;;  %v3018_v51 = vpack.c.bf16 %v231_v49, %v230_v48  ;;  %v233_v54 = vld [vmem:[%s3391_s4 + $0x38] sm:$0xff]  ;;  %v248_v57 = vld [vmem:[#allocation4] sm:$0xff]  ;;  %v3079_v9 = vld [vmem:[%s3392_s5] ss:$0 sm:$0xff] }
  0x31   :  { %2518 = vmatprep.subr.bf16.mxu0 %v2843_v0  ;;  %v3034_v56 = vpack.c.bf16 %v233_v54, %v232_v53  ;;  %v1953_v28 = vld [vmem:[%s3393_s6 + $0x10] sm:$0xff] }
  0x32   :  { %2263 = vmatmul.mubr.msk.f32.vlgmr.msra.gmra.mrb[0].mxu1 %vm62_vm1, %v246_v13  ;;  %2246 = vmatmul.mubr.msk.f32.gmra.mrb[2].mxu0 %vm84_vm2, %v70_v42 }
  0x33   :  { %2529 = vmatpush3.bf16.msra.mxu1 %v2933_v8  ;;  %2292 = vmatprep.mubr.msk.f32.mxu1 %vm2844_vm0, %v2845_v1 }
  0x34   :  { %2530 = vmatprep.subr.bf16.mxu1 %v2843_v0  ;;  %2248 = vmatprep.mubr.msk.f32.mxu0 %vm84_vm2, %v71_v45 }
  0x35   :  { %2520 = vmatpush3.bf16.msra.mxu0 %v3000_v46 }
  0x36   :  { %2249 = vmatmul.mubr.msk.f32.gmra.mrb[4].mxu0 %vm84_vm2, %v72_v47  ;;  %2521 = vmatprep.subr.bf16.mxu0 %v2843_v0 }
  0x37   :  { %2532 = vmatpush3.bf16.msra.mxu1 %v2940_v12  ;;  %2251 = vmatprep.mubr.msk.f32.mxu0 %vm84_vm2, %v73_v50 }
  0x38   :  { %2533 = vmatprep.subr.bf16.mxu1 %v2843_v0 }
  0x39   :  { %2523 = vmatpush3.bf16.msra.mxu0 %v3018_v51 }
  0x3a   :  { %2252 = vmatmul.mubr.msk.f32.gmra.mrb[6].mxu0 %vm84_vm2, %v74_v52  ;;  %2524 = vmatprep.subr.bf16.mxu0 %v2843_v0 }
  0x3b   :  { %2281 = vmatprep.mubr.msk.f32.mxu0 %vm2844_vm0, %v2845_v1 }
  0x3d   :  { %2526 = vmatpush3.bf16.msra.mxu0 %v3034_v56 }
  0x3e   :  { %2545 = vmatprep.subr.bf16.mxu0 %v2843_v0 }
 0x101   :  { %v2959_v15 = vpop.f32.mrb[0].mxu0 }
 0x102   :  { %v175_v16 = vpop.f32.mrb[1].mxu0  ;;  %v181_v7 = vadd.f32 %v2959_v15, %v2957_v14 }
 0x103   :  { %v176_v17 = vadd.f32 %v2957_v14, %v175_v16 }
 0x105   :  { %v321_v18 = vpop.f32.mrb[0].mxu1  ;;  %v3043_v60 = vpop.f32.mrb[2].mxu0 }
 0x106   :  { %v325_v19 = vadd.f32 %v321_v18, %v176_v17  ;;  %v2264_v20 = vpop.f32.mrb[1].mxu1  ;;  %v3045_v61 = vpop.f32.mrb[3].mxu0 }
 0x108   :  { %v2062_v21 = vmul.f32 -1.442695, %v325_v19 }
 0x109   :  { %v3047_v62 = vpop.f32.mrb[4].mxu0 }
 0x10a   :  { %2670 = vpow2.f32 %v2062_v21  ;;  %v3049_v63 = vpop.f32.mrb[5].mxu0 }
 0x10d   :  { %v3051_v2 = vpop.f32.mrb[6].mxu0 }
 0x10e   :  { %v3053_v3 = vpop.f32.mrb[7].mxu0 }
 0x114   :  { %v2671_v22 = vpop.eup %2670 }
 0x115   :  { %v329_v23 = vadd.f32 1.0, %v2671_v22 }
 0x117   :  { %2672 = vrcp.f32 %v329_v23 }
 0x121   :  { %v2673_v26 = vpop.eup %2672 }
 0x122   :  { %v332_v27 = vmul.f32 2.0, %v2673_v26 }
 0x124   :  { %v2063_v29 = vadd.f32 -1.0, %v332_v27 }
 0x126   :  { %v334_v30 = vsel %vm2962_vm5, %v2063_v29, %v2673_v26 }
 0x127   :  { %341 = vrot.lane.b32.xlu0 %v334_v30, %s2846_s13 }
 0x12b   :  { %336 = vrot.lane.b32.xlu0 %v247_v31, %s2847_s14 }
 0x199   :  { %v342_v32 = vpop.permute.xlu0 %341 }
 0x19a   :  { %v344_v33 = vmul.f32 %v342_v32, %v334_v30 }
 0x19c   :  { %346 = vrot.lane.b32.xlu1 %v344_v33, %s2847_s14  ;;  %v249_v33 = vld [vmem:[#allocation5] sm:$0xff] }
 0x19d   :  { %v337_v34 = vpop.permute.xlu0 %336 }
 0x19e   :  { %v339_v35 = vmul.f32 %v337_v34, %v334_v30 }
 0x20e   :  { %v347_v36 = vpop.permute.xlu1 %346 }
 0x20f   :  { %v2971_v37 = vadd.f32 %v347_v36, %v339_v35 }
 0x211   :  { %2674 = vtanh.f32 %v2971_v37 }
 0x21b   :  { %v2675_v55 = vpop.eup %2674 }
 0x21c   :  { %352 = vrot.lane.b32.xlu1 %v2675_v55, %s2846_s13 }
 0x220   :  { %361 = vrot.lane.b32.xlu1 %v248_v57, %s2847_s14 }
 0x28e   :  { %v353_v58 = vpop.permute.xlu1 %352 }
 0x28f   :  { %v355_v59 = vmul.f32 %v353_v58, %v334_v30  ;;  %v186_v58 = vadd.f32 %v2957_v14, %v3045_v61 }
 0x291   :  { %357 = vrot.lane.b32.xlu0 %v355_v59, %s2847_s14 }
 0x292   :  { %v362_v4 = vpop.permute.xlu1 %361 }
 0x303   :  { %v358_v5 = vpop.permute.xlu0 %357 }
 0x304   :  { %v364_v6 = vsel %vm62_vm1, %v358_v5, %v362_v4  ;;  %2293 = vmatmul.mubr.msk.f32.vlgmr.msra.gmra.mrb[2].mxu1 %vm62_vm1, %v358_v5 }
 0x305   :  { %2282 = vmatmul.mubr.msk.f32.vlgmr.msra.gmra.mrb[8].mxu0 %vm365_vm6, %v364_v6  ;;  %2535 = vmatpush3.bf16.msra.mxu1 %v2983_v41 }
 0x306   :  { %2536 = vmatprep.subr.bf16.mxu1 %v2843_v0  ;;  %2547 = vmatpush3.bf16.msra.mxu0 %v2933_v8 }
 0x307   :  { %2548 = vmatprep.subr.bf16.mxu0 %v2843_v0  ;;  %2322 = vmatprep.mubr.msk.f32.mxu0 %vm2844_vm0, %v2845_v1 }
 0x308   :  { %2311 = vmatprep.mubr.msk.f32.mxu1 %vm2844_vm0, %v2845_v1 }
 0x309   :  { %2538 = vmatpush3.bf16.msra.mxu1 %v3000_v46 }
 0x30a   :  { %2539 = vmatprep.subr.bf16.mxu1 %v2843_v0  ;;  %2550 = vmatpush3.bf16.msra.mxu0 %v2940_v12 }
 0x30b   :  { %2551 = vmatprep.subr.bf16.mxu0 %v2843_v0 }
 0x30d   :  { %2541 = vmatpush3.bf16.msra.mxu1 %v3018_v51 }
 0x30e   :  { %2542 = vmatprep.subr.bf16.mxu1 %v2843_v0 }
 0x311   :  { %2544 = vmatpush3.bf16.msra.mxu1 %v3034_v56 }
 0x312   :  { %2563 = vmatprep.subr.bf16.mxu1 %v2843_v0 }
 0x3d7   :  { %v539_v10 = vpop.f32.mrb[2].mxu1 }
 0x3d8   :  { %v543_v11 = vadd.f32 %v539_v10, %v181_v7  ;;  %v435_v13 = vpop.f32.mrb[8].mxu0  ;;  %v2294_v16 = vpop.f32.mrb[3].mxu1 }
 0x3d9   :  { %v436_v17 = vadd.f32 %v3079_v9, %v435_v13  ;;  %v2283_v18 = vpop.f32.mrb[9].mxu0 }
 0x3da   :  { %v2068_v19 = vmul.f32 -1.442695, %v543_v11 }
 0x3db   :  { %v2065_v20 = vmul.f32 -1.442695, %v436_v17 }
 0x3dc   :  { %2676 = vpow2.f32 %v2068_v19 }
 0x3dd   :  { %2678 = vpow2.f32 %v2065_v20 }
 0x3e6   :  { %v2677_v21 = vpop.eup %2676 }
 0x3e7   :  { %v2679_v22 = vpop.eup %2678  ;;  %v547_v23 = vadd.f32 1.0, %v2677_v21 }
 0x3e8   :  { %v442_v15 = vadd.f32 1.0, %v2679_v22 }
 0x3e9   :  { %2680 = vrcp.f32 %v547_v23 }
 0x3ea   :  { %2682 = vrcp.f32 %v442_v15 }
 0x3f3   :  { %v2681_v24 = vpop.eup %2680 }
 0x3f4   :  { %v2683_v25 = vpop.eup %2682  ;;  %v550_v26 = vmul.f32 2.0, %v2681_v24 }
 0x3f5   :  { %v445_v27 = vmul.f32 2.0, %v2683_v25 }
 0x3f6   :  { %v2069_v29 = vadd.f32 -1.0, %v550_v26 }
 0x3f7   :  { %v2066_v30 = vadd.f32 -1.0, %v445_v27 }
 0x3f8   :  { %v552_v31 = vsel %vm2962_vm5, %v2069_v29, %v2681_v24 }
 0x3f9   :  { %555 = vrot.lane.b32.xlu1 %v552_v31, %s2846_s13  ;;  %v447_v32 = vsel %vm2962_vm5, %v2066_v30, %v2683_v25  ;;  %v553_v40 = vmul.f32 %v552_v31, %v2971_v37 }
 0x3fa   :  { %454 = vrot.lane.b32.xlu0 %v447_v32, %s2846_s13 }
 0x3fe   :  { %449 = vrot.lane.b32.xlu0 %v249_v33, %s2847_s14 }
 0x46b   :  { %v556_v34 = vpop.permute.xlu1 %555 }
 0x46c   :  { %v558_v35 = vmul.f32 %v556_v34, %v552_v31  ;;  %v455_v36 = vpop.permute.xlu0 %454 }
 0x46d   :  { %v457_v38 = vmul.f32 %v455_v36, %v447_v32 }
 0x46e   :  { %560 = vrot.lane.b32.xlu0 %v558_v35, %s2847_s14 }
 0x46f   :  { %459 = vrot.lane.b32.xlu1 %v457_v38, %s2847_s14 }
 0x470   :  { %v450_v39 = vpop.permute.xlu0 %449 }
 0x471   :  { %v452_v42 = vmul.f32 %v450_v39, %v447_v32 }
 0x4e0   :  { %v561_v43 = vpop.permute.xlu0 %560 }
 0x4e1   :  { %v3092_v44 = vadd.f32 %v561_v43, %v553_v40  ;;  %v460_v45 = vpop.permute.xlu1 %459 }
 0x4e2   :  { %v3094_v47 = vadd.f32 %v460_v45, %v452_v42 }
 0x4e3   :  { %2684 = vtanh.f32 %v3092_v44 }
 0x4e4   :  { %2686 = vtanh.f32 %v3094_v47 }
 0x4ed   :  { %v2685_v48 = vpop.eup %2684 }
 0x4ee   :  { %v2687_v49 = vpop.eup %2686  ;;  %566 = vrot.lane.b32.xlu0 %v2685_v48, %s2846_s13 }
 0x4ef   :  { %465 = vrot.lane.b32.xlu1 %v2687_v49, %s2846_s13  ;;  %v191_v49 = vadd.f32 %v3043_v60, %v2957_v14 }
 0x560   :  { %v567_v50 = vpop.permute.xlu0 %566 }
 0x561   :  { %v569_v52 = vmul.f32 %v567_v50, %v552_v31  ;;  %v466_v37 = vpop.permute.xlu1 %465 }
 0x562   :  { %v468_v53 = vmul.f32 %v466_v37, %v447_v32 }
 0x563   :  { %571 = vrot.lane.b32.xlu1 %v569_v52, %s2847_s14 }
 0x564   :  { %575 = vrot.lane.b32.xlu0 %v468_v53, %s2846_s13 }
 0x5d5   :  { %v572_v54 = vpop.permute.xlu1 %571 }
 0x5d6   :  { %2323 = vmatmul.mubr.msk.f32.vlgmr.msra.gmra.mrb[10].mxu0 %vm62_vm1, %v572_v54  ;;  %v576_v55 = vpop.permute.xlu0 %575 }
 0x5d7   :  { %v578_v57 = vsel %vm62_vm1, %v572_v54, %v576_v55  ;;  %2553 = vmatpush3.bf16.msra.mxu0 %v2983_v41  ;;  %2341 = vmatprep.mubr.msk.f32.mxu0 %vm2844_vm0, %v2845_v1 }
 0x5d8   :  { %2312 = vmatmul.mubr.msk.f32.vlgmr.msra.gmra.mrb[4].mxu1 %vm365_vm6, %v578_v57  ;;  %2554 = vmatprep.subr.bf16.mxu0 %v2843_v0 }
 0x5d9   :  { %2565 = vmatpush3.bf16.msra.mxu1 %v2933_v8  ;;  %2352 = vmatprep.mubr.msk.f32.mxu1 %vm2844_vm0, %v2845_v1 }
 0x5da   :  { %2566 = vmatprep.subr.bf16.mxu1 %v2843_v0 }
 0x5db   :  { %2556 = vmatpush3.bf16.msra.mxu0 %v3000_v46 }
 0x5dc   :  { %2557 = vmatprep.subr.bf16.mxu0 %v2843_v0 }
 0x5dd   :  { %2568 = vmatpush3.bf16.msra.mxu1 %v2940_v12 }
 0x5de   :  { %2569 = vmatprep.subr.bf16.mxu1 %v2843_v0 }
 0x5df   :  { %2559 = vmatpush3.bf16.msra.mxu0 %v3018_v51 }
 0x5e0   :  { %2560 = vmatprep.subr.bf16.mxu0 %v2843_v0 }
 0x5e3   :  { %2562 = vmatpush3.bf16.msra.mxu0 %v3034_v56 }
 0x5e4   :  { %2581 = vmatprep.subr.bf16.mxu0 %v2843_v0 }
 0x6a9   :  { %v748_v59 = vpop.f32.mrb[10].mxu0 }
 0x6aa   :  { %v752_v4 = vadd.f32 %v748_v59, %v186_v58  ;;  %v2324_v5 = vpop.f32.mrb[11].mxu0 }
 0x6ab   :  { %v648_v6 = vpop.f32.mrb[4].mxu1 }
 0x6ac   :  { %v2074_v7 = vmul.f32 -1.442695, %v752_v4  ;;  %v649_v10 = vadd.f32 %v3079_v9, %v648_v6  ;;  %v2313_v11 = vpop.f32.mrb[5].mxu1 }
 0x6ae   :  { %2688 = vpow2.f32 %v2074_v7  ;;  %v2071_v13 = vmul.f32 -1.442695, %v649_v10 }
 0x6b0   :  { %2690 = vpow2.f32 %v2071_v13 }
 0x6b8   :  { %v2689_v16 = vpop.eup %2688 }
 0x6b9   :  { %v756_v17 = vadd.f32 1.0, %v2689_v16 }
 0x6ba   :  { %v2691_v18 = vpop.eup %2690 }
 0x6bb   :  { %2692 = vrcp.f32 %v756_v17  ;;  %v655_v19 = vadd.f32 1.0, %v2691_v18 }
 0x6bd   :  { %2694 = vrcp.f32 %v655_v19 }
 0x6c5   :  { %v2693_v20 = vpop.eup %2692 }
 0x6c6   :  { %v759_v21 = vmul.f32 2.0, %v2693_v20 }
 0x6c7   :  { %v2695_v61 = vpop.eup %2694 }
 0x6c8   :  { %v2075_v22 = vadd.f32 -1.0, %v759_v21  ;;  %v658_v23 = vmul.f32 2.0, %v2695_v61 }
 0x6ca   :  { %v761_v15 = vsel %vm2962_vm5, %v2075_v22, %v2693_v20  ;;  %v2072_v24 = vadd.f32 -1.0, %v658_v23 }
 0x6cb   :  { %764 = vrot.lane.b32.xlu0 %v761_v15, %s2846_s13  ;;  %v762_v31 = vmul.f32 %v761_v15, %v3092_v44 }
 0x6cc   :  { %v660_v25 = vsel %vm2962_vm5, %v2072_v24, %v2695_v61 }
 0x6cd   :  { %663 = vrot.lane.b32.xlu1 %v660_v25, %s2846_s13  ;;  %v661_v34 = vmul.f32 %v660_v25, %v3094_v47 }
 0x73d   :  { %v765_v26 = vpop.permute.xlu0 %764 }
 0x73e   :  { %v767_v27 = vmul.f32 %v765_v26, %v761_v15 }
 0x73f   :  { %v664_v29 = vpop.permute.xlu1 %663 }
 0x740   :  { %v666_v30 = vmul.f32 %v664_v29, %v660_v25  ;;  %769 = vrot.lane.b32.xlu0 %v767_v27, %s2847_s14 }
 0x742   :  { %668 = vrot.lane.b32.xlu1 %v666_v30, %s2847_s14 }
 0x7b2   :  { %v770_v32 = vpop.permute.xlu0 %769 }
 0x7b3   :  { %v3133_v33 = vadd.f32 %v770_v32, %v762_v31 }
 0x7b4   :  { %v669_v35 = vpop.permute.xlu1 %668 }
 0x7b5   :  { %2696 = vtanh.f32 %v3133_v33  ;;  %v3137_v36 = vadd.f32 %v669_v35, %v661_v34 }
 0x7b7   :  { %2698 = vtanh.f32 %v3137_v36 }
 0x7bf   :  { %v2697_v38 = vpop.eup %2696 }
 0x7c0   :  { %775 = vrot.lane.b32.xlu0 %v2697_v38, %s2846_s13  ;;  %v196_v38 = vadd.f32 %v2957_v14, %v3049_v63 }
 0x7c1   :  { %v2699_v39 = vpop.eup %2698 }
 0x7c2   :  { %674 = vrot.lane.b32.xlu1 %v2699_v39, %s2846_s13 }
 0x832   :  { %v776_v40 = vpop.permute.xlu0 %775 }
 0x833   :  { %v778_v42 = vmul.f32 %v776_v40, %v761_v15 }
 0x834   :  { %v675_v43 = vpop.permute.xlu1 %674 }
 0x835   :  { %v677_v44 = vmul.f32 %v675_v43, %v660_v25  ;;  %780 = vrot.lane.b32.xlu1 %v778_v42, %s2847_s14 }
 0x837   :  { %784 = vrot.lane.b32.xlu0 %v677_v44, %s2846_s13 }
 0x8a7   :  { %v781_v45 = vpop.permute.xlu1 %780 }
 0x8a8   :  { %2353 = vmatmul.mubr.msk.f32.vlgmr.msra.gmra.mrb[6].mxu1 %vm62_vm1, %v781_v45 }
 0x8a9   :  { %v785_v47 = vpop.permute.xlu0 %784  ;;  %2571 = vmatpush3.bf16.msra.mxu1 %v2983_v41  ;;  %2371 = vmatprep.mubr.msk.f32.mxu1 %vm2844_vm0, %v2845_v1 }
 0x8aa   :  { %v787_v48 = vsel %vm62_vm1, %v781_v45, %v785_v47  ;;  %2572 = vmatprep.subr.bf16.mxu1 %v2843_v0 }
 0x8ab   :  { %2342 = vmatmul.mubr.msk.f32.vlgmr.msra.gmra.mrb[12].mxu0 %vm365_vm6, %v787_v48 }
 0x8ac   :  { %2583 = vmatpush3.bf16.msra.mxu0 %v2933_v8  ;;  %2382 = vmatprep.mubr.msk.f32.mxu0 %vm2844_vm0, %v2845_v1 }
 0x8ad   :  { %2574 = vmatpush3.bf16.msra.mxu1 %v3000_v46  ;;  %2584 = vmatprep.subr.bf16.mxu0 %v2843_v0 }
 0x8ae   :  { %2575 = vmatprep.subr.bf16.mxu1 %v2843_v0 }
 0x8b0   :  { %2586 = vmatpush3.bf16.msra.mxu0 %v2940_v12 }
 0x8b1   :  { %2577 = vmatpush3.bf16.msra.mxu1 %v3018_v51  ;;  %2587 = vmatprep.subr.bf16.mxu0 %v2843_v0 }
 0x8b2   :  { %2578 = vmatprep.subr.bf16.mxu1 %v2843_v0 }
 0x8b5   :  { %2580 = vmatpush3.bf16.msra.mxu1 %v3034_v56 }
 0x8b6   :  { %2599 = vmatprep.subr.bf16.mxu1 %v2843_v0 }
 0x97b   :  { %v957_v50 = vpop.f32.mrb[6].mxu1 }
 0x97c   :  { %v961_v52 = vadd.f32 %v957_v50, %v191_v49  ;;  %v2354_v37 = vpop.f32.mrb[7].mxu1 }
 0x97e   :  { %v2080_v53 = vmul.f32 -1.442695, %v961_v52  ;;  %v857_v54 = vpop.f32.mrb[12].mxu0 }
 0x97f   :  { %v858_v55 = vadd.f32 %v3079_v9, %v857_v54  ;;  %v2343_v57 = vpop.f32.mrb[13].mxu0 }
 0x980   :  { %2700 = vpow2.f32 %v2080_v53 }
 0x981   :  { %v2077_v58 = vmul.f32 -1.442695, %v858_v55 }
 0x983   :  { %2702 = vpow2.f32 %v2077_v58 }
 0x98a   :  { %v2701_v59 = vpop.eup %2700 }
 0x98b   :  { %v965_v4 = vadd.f32 1.0, %v2701_v59 }
 0x98d   :  { %v2703_v5 = vpop.eup %2702  ;;  %2704 = vrcp.f32 %v965_v4 }
 0x98e   :  { %v864_v6 = vadd.f32 1.0, %v2703_v5 }
 0x990   :  { %2706 = vrcp.f32 %v864_v6 }
 0x997   :  { %v2705_v7 = vpop.eup %2704 }
 0x998   :  { %v968_v10 = vmul.f32 2.0, %v2705_v7 }
 0x99a   :  { %v2707_v60 = vpop.eup %2706  ;;  %v2081_v11 = vadd.f32 -1.0, %v968_v10 }
 0x99b   :  { %v867_v13 = vmul.f32 2.0, %v2707_v60 }
 0x99c   :  { %v970_v16 = vsel %vm2962_vm5, %v2081_v11, %v2705_v7 }
 0x99d   :  { %973 = vrot.lane.b32.xlu0 %v970_v16, %s2846_s13  ;;  %v2078_v17 = vadd.f32 -1.0, %v867_v13  ;;  %v971_v22 = vmul.f32 %v970_v16, %v3133_v33 }
 0x99f   :  { %v869_v18 = vsel %vm2962_vm5, %v2078_v17, %v2707_v60 }
 0x9a0   :  { %872 = vrot.lane.b32.xlu1 %v869_v18, %s2846_s13  ;;  %v870_v24 = vmul.f32 %v869_v18, %v3137_v36 }
 0xa0f   :  { %v974_v19 = vpop.permute.xlu0 %973 }
 0xa10   :  { %v976_v20 = vmul.f32 %v974_v19, %v970_v16 }
 0xa12   :  { %v873_v21 = vpop.permute.xlu1 %872  ;;  %978 = vrot.lane.b32.xlu0 %v976_v20, %s2847_s14 }
 0xa13   :  { %v875_v61 = vmul.f32 %v873_v21, %v869_v18 }
 0xa15   :  { %877 = vrot.lane.b32.xlu1 %v875_v61, %s2847_s14 }
 0xa84   :  { %v979_v23 = vpop.permute.xlu0 %978 }
 0xa85   :  { %v3175_v15 = vadd.f32 %v979_v23, %v971_v22 }
 0xa87   :  { %2708 = vtanh.f32 %v3175_v15  ;;  %v878_v25 = vpop.permute.xlu1 %877 }
 0xa88   :  { %v3179_v26 = vadd.f32 %v878_v25, %v870_v24 }
 0xa8a   :  { %2710 = vtanh.f32 %v3179_v26 }
 0xa91   :  { %v2709_v27 = vpop.eup %2708 }
 0xa92   :  { %984 = vrot.lane.b32.xlu0 %v2709_v27, %s2846_s13 }
 0xa94   :  { %v2711_v29 = vpop.eup %2710 }
 0xa95   :  { %883 = vrot.lane.b32.xlu1 %v2711_v29, %s2846_s13 }
 0xb04   :  { %v985_v30 = vpop.permute.xlu0 %984 }
 0xb05   :  { %v987_v31 = vmul.f32 %v985_v30, %v970_v16 }
 0xb07   :  { %v884_v32 = vpop.permute.xlu1 %883  ;;  %989 = vrot.lane.b32.xlu1 %v987_v31, %s2847_s14 }
 0xb08   :  { %v886_v33 = vmul.f32 %v884_v32, %v869_v18 }
 0xb0a   :  { %993 = vrot.lane.b32.xlu0 %v886_v33, %s2846_s13 }
 0xb79   :  { %v990_v34 = vpop.permute.xlu1 %989 }
 0xb7a   :  { %2383 = vmatmul.mubr.msk.f32.vlgmr.msra.gmra.mrb[14].mxu0 %vm62_vm1, %v990_v34 }
 0xb7b   :  { %2589 = vmatpush3.bf16.msra.mxu0 %v2983_v41  ;;  %2401 = vmatprep.mubr.msk.f32.mxu0 %vm2844_vm0, %v2845_v1 }
 0xb7c   :  { %v994_v35 = vpop.permute.xlu0 %993  ;;  %2590 = vmatprep.subr.bf16.mxu0 %v2843_v0 }
 0xb7d   :  { %v996_v36 = vsel %vm62_vm1, %v990_v34, %v994_v35 }
 0xb7e   :  { %2372 = vmatmul.mubr.msk.f32.vlgmr.msra.gmra.mrb[8].mxu1 %vm365_vm6, %v996_v36 }
 0xb7f   :  { %2601 = vmatpush3.bf16.msra.mxu1 %v2933_v8  ;;  %2592 = vmatpush3.bf16.msra.mxu0 %v3000_v46 }
 0xb80   :  { %2602 = vmatprep.subr.bf16.mxu1 %v2843_v0  ;;  %2593 = vmatprep.subr.bf16.mxu0 %v2843_v0 }
 0xb81   :  { %2412 = vmatprep.mubr.msk.f32.mxu1 %vm2844_vm0, %v2845_v1 }
 0xb83   :  { %2604 = vmatpush3.bf16.msra.mxu1 %v2940_v12  ;;  %2595 = vmatpush3.bf16.msra.mxu0 %v3018_v51 }
 0xb84   :  { %2596 = vmatprep.subr.bf16.mxu0 %v2843_v0  ;;  %2605 = vmatprep.subr.bf16.mxu1 %v2843_v0 }
 0xb87   :  { %2598 = vmatpush3.bf16.msra.mxu0 %v3034_v56 }
 0xb88   :  { %2617 = vmatprep.subr.bf16.mxu0 %v2843_v0 }
 0xc4d   :  { %v1166_v39 = vpop.f32.mrb[14].mxu0 }
 0xc4e   :  { %v1170_v40 = vadd.f32 %v1166_v39, %v196_v38  ;;  %v2384_v42 = vpop.f32.mrb[15].mxu0 }
 0xc50   :  { %v2086_v43 = vmul.f32 -1.442695, %v1170_v40 }
 0xc51   :  { %v1066_v44 = vpop.f32.mrb[8].mxu1 }
 0xc52   :  { %2712 = vpow2.f32 %v2086_v43  ;;  %v1067_v45 = vadd.f32 %v3079_v9, %v1066_v44  ;;  %v2373_v47 = vpop.f32.mrb[9].mxu1 }
 0xc54   :  { %v2083_v48 = vmul.f32 -1.442695, %v1067_v45 }
 0xc56   :  { %2714 = vpow2.f32 %v2083_v48 }
 0xc5c   :  { %v2713_v49 = vpop.eup %2712 }
 0xc5d   :  { %v1174_v50 = vadd.f32 1.0, %v2713_v49 }
 0xc5f   :  { %2716 = vrcp.f32 %v1174_v50 }
 0xc60   :  { %v2715_v52 = vpop.eup %2714 }
 0xc61   :  { %v1073_v37 = vadd.f32 1.0, %v2715_v52 }
 0xc63   :  { %2718 = vrcp.f32 %v1073_v37 }
 0xc69   :  { %v2717_v53 = vpop.eup %2716 }
 0xc6a   :  { %v1177_v54 = vmul.f32 2.0, %v2717_v53 }
 0xc6c   :  { %v2087_v63 = vadd.f32 -1.0, %v1177_v54 }
 0xc6d   :  { %v2719_v55 = vpop.eup %2718 }
 0xc6e   :  { %v1179_v57 = vsel %vm2962_vm5, %v2087_v63, %v2717_v53  ;;  %v1076_v58 = vmul.f32 2.0, %v2719_v55 }
 0xc6f   :  { %1182 = vrot.lane.b32.xlu0 %v1179_v57, %s2846_s13  ;;  %v1180_v60 = vmul.f32 %v1179_v57, %v3175_v15 }
 0xc70   :  { %v2084_v59 = vadd.f32 -1.0, %v1076_v58 }
 0xc72   :  { %v1078_v4 = vsel %vm2962_vm5, %v2084_v59, %v2719_v55 }
 0xc73   :  { %1081 = vrot.lane.b32.xlu1 %v1078_v4, %s2846_s13  ;;  %v1079_v16 = vmul.f32 %v1078_v4, %v3179_v26  ;;  %v201_v26 = vadd.f32 %v3047_v62, %v2957_v14 }
 0xce1   :  { %v1183_v5 = vpop.permute.xlu0 %1182 }
 0xce2   :  { %v1185_v6 = vmul.f32 %v1183_v5, %v1179_v57 }
 0xce4   :  { %1187 = vrot.lane.b32.xlu0 %v1185_v6, %s2847_s14 }
 0xce5   :  { %v1082_v7 = vpop.permute.xlu1 %1081 }
 0xce6   :  { %v1084_v10 = vmul.f32 %v1082_v7, %v1078_v4 }
 0xce8   :  { %1086 = vrot.lane.b32.xlu1 %v1084_v10, %s2847_s14 }
 0xd56   :  { %v1188_v11 = vpop.permute.xlu0 %1187 }
 0xd57   :  { %v3217_v13 = vadd.f32 %v1188_v11, %v1180_v60 }
 0xd59   :  { %2720 = vtanh.f32 %v3217_v13 }
 0xd5a   :  { %v1087_v17 = vpop.permute.xlu1 %1086 }
 0xd5b   :  { %v3221_v18 = vadd.f32 %v1087_v17, %v1079_v16 }
 0xd5d   :  { %2722 = vtanh.f32 %v3221_v18 }
 0xd63   :  { %v2721_v19 = vpop.eup %2720 }
 0xd64   :  { %1193 = vrot.lane.b32.xlu0 %v2721_v19, %s2846_s13 }
 0xd67   :  { %v2723_v20 = vpop.eup %2722 }
 0xd68   :  { %1092 = vrot.lane.b32.xlu1 %v2723_v20, %s2846_s13 }
 0xdd6   :  { %v1194_v21 = vpop.permute.xlu0 %1193 }
 0xdd7   :  { %v1196_v61 = vmul.f32 %v1194_v21, %v1179_v57 }
 0xdd9   :  { %1198 = vrot.lane.b32.xlu1 %v1196_v61, %s2847_s14 }
 0xdda   :  { %v1093_v22 = vpop.permute.xlu1 %1092 }
 0xddb   :  { %v1095_v23 = vmul.f32 %v1093_v22, %v1078_v4 }
 0xddd   :  { %1202 = vrot.lane.b32.xlu0 %v1095_v23, %s2846_s13 }
 0xe4b   :  { %v1199_v15 = vpop.permute.xlu1 %1198 }
 0xe4c   :  { %2413 = vmatmul.mubr.msk.f32.vlgmr.msra.gmra.mrb[10].mxu1 %vm62_vm1, %v1199_v15 }
 0xe4d   :  { %2607 = vmatpush3.bf16.msra.mxu1 %v2983_v41  ;;  %2431 = vmatprep.mubr.msk.f32.mxu1 %vm2844_vm0, %v2845_v1 }
 0xe4e   :  { %2608 = vmatprep.subr.bf16.mxu1 %v2843_v0 }
 0xe4f   :  { %v1203_v24 = vpop.permute.xlu0 %1202 }
 0xe50   :  { %v1205_v25 = vsel %vm62_vm1, %v1199_v15, %v1203_v24 }
 0xe51   :  { %2402 = vmatmul.mubr.msk.f32.vlgmr.msra.gmra.mrb[16].mxu0 %vm365_vm6, %v1205_v25  ;;  %2610 = vmatpush3.bf16.msra.mxu1 %v3000_v46 }
 0xe52   :  { %2619 = vmatpush3.bf16.msra.mxu0 %v2933_v8  ;;  %2611 = vmatprep.subr.bf16.mxu1 %v2843_v0 }
 0xe53   :  { %2620 = vmatprep.subr.bf16.mxu0 %v2843_v0  ;;  %2442 = vmatprep.mubr.msk.f32.mxu0 %vm2844_vm0, %v2845_v1 }
 0xe55   :  { %2613 = vmatpush3.bf16.msra.mxu1 %v3018_v51 }
 0xe56   :  { %2622 = vmatpush3.bf16.msra.mxu0 %v2940_v12  ;;  %2614 = vmatprep.subr.bf16.mxu1 %v2843_v0 }
 0xe57   :  { %2623 = vmatprep.subr.bf16.mxu0 %v2843_v0 }
 0xe59   :  { %2616 = vmatpush3.bf16.msra.mxu1 %v3034_v56 }
 0xe5a   :  { %2635 = vmatprep.subr.bf16.mxu1 %v2843_v0 }
 0xf1f   :  { %v1375_v27 = vpop.f32.mrb[10].mxu1 }
 0xf20   :  { %v1379_v29 = vadd.f32 %v1375_v27, %v201_v26  ;;  %v2414_v30 = vpop.f32.mrb[11].mxu1 }
 0xf22   :  { %v2092_v31 = vmul.f32 -1.442695, %v1379_v29 }
 0xf24   :  { %2724 = vpow2.f32 %v2092_v31  ;;  %v1275_v32 = vpop.f32.mrb[16].mxu0 }
 0xf25   :  { %v1276_v33 = vadd.f32 %v3079_v9, %v1275_v32  ;;  %v2403_v34 = vpop.f32.mrb[17].mxu0 }
 0xf27   :  { %v2089_v35 = vmul.f32 -1.442695, %v1276_v33 }
 0xf29   :  { %2726 = vpow2.f32 %v2089_v35 }
 0xf2e   :  { %v2725_v36 = vpop.eup %2724 }
 0xf2f   :  { %v1383_v38 = vadd.f32 1.0, %v2725_v36 }
 0xf31   :  { %2728 = vrcp.f32 %v1383_v38 }
 0xf33   :  { %v2727_v39 = vpop.eup %2726 }
 0xf34   :  { %v1282_v40 = vadd.f32 1.0, %v2727_v39 }
 0xf36   :  { %2730 = vrcp.f32 %v1282_v40 }
 0xf3b   :  { %v2729_v42 = vpop.eup %2728 }
 0xf3c   :  { %v1386_v43 = vmul.f32 2.0, %v2729_v42 }
 0xf3e   :  { %v2093_v62 = vadd.f32 -1.0, %v1386_v43 }
 0xf40   :  { %v2731_v44 = vpop.eup %2730  ;;  %v1388_v45 = vsel %vm2962_vm5, %v2093_v62, %v2729_v42 }
 0xf41   :  { %1391 = vrot.lane.b32.xlu0 %v1388_v45, %s2846_s13  ;;  %v1285_v47 = vmul.f32 2.0, %v2731_v44  ;;  %v1389_v54 = vmul.f32 %v1388_v45, %v3217_v13 }
 0xf43   :  { %v2090_v48 = vadd.f32 -1.0, %v1285_v47 }
 0xf45   :  { %v1287_v49 = vsel %vm2962_vm5, %v2090_v48, %v2731_v44 }
 0xf46   :  { %1290 = vrot.lane.b32.xlu1 %v1287_v49, %s2846_s13  ;;  %v1288_v57 = vmul.f32 %v1287_v49, %v3221_v18 }
 0xfb3   :  { %v1392_v50 = vpop.permute.xlu0 %1391 }
 0xfb4   :  { %v1394_v52 = vmul.f32 %v1392_v50, %v1388_v45 }
 0xfb6   :  { %1396 = vrot.lane.b32.xlu0 %v1394_v52, %s2847_s14 }
 0xfb8   :  { %v1291_v37 = vpop.permute.xlu1 %1290 }
 0xfb9   :  { %v1293_v53 = vmul.f32 %v1291_v37, %v1287_v49 }
 0xfbb   :  { %1295 = vrot.lane.b32.xlu1 %v1293_v53, %s2847_s14 }
0x1028   :  { %v1397_v63 = vpop.permute.xlu0 %1396 }
0x1029   :  { %v3259_v55 = vadd.f32 %v1397_v63, %v1389_v54 }
0x102b   :  { %2732 = vtanh.f32 %v3259_v55 }
0x102d   :  { %v1296_v58 = vpop.permute.xlu1 %1295 }
0x102e   :  { %v3263_v59 = vadd.f32 %v1296_v58, %v1288_v57 }
0x1030   :  { %2734 = vtanh.f32 %v3263_v59 }
0x1035   :  { %v2733_v4 = vpop.eup %2732 }
0x1036   :  { %1402 = vrot.lane.b32.xlu0 %v2733_v4, %s2846_s13 }
0x103a   :  { %v2735_v5 = vpop.eup %2734 }
0x103b   :  { %1301 = vrot.lane.b32.xlu1 %v2735_v5, %s2846_s13 }
0x10a8   :  { %v1403_v6 = vpop.permute.xlu0 %1402 }
0x10a9   :  { %v1405_v7 = vmul.f32 %v1403_v6, %v1388_v45 }
0x10ab   :  { %1407 = vrot.lane.b32.xlu1 %v1405_v7, %s2847_s14 }
0x10ad   :  { %v1302_v10 = vpop.permute.xlu1 %1301 }
0x10ae   :  { %v1304_v60 = vmul.f32 %v1302_v10, %v1287_v49 }
0x10b0   :  { %1411 = vrot.lane.b32.xlu0 %v1304_v60, %s2846_s13 }
0x111d   :  { %v1408_v11 = vpop.permute.xlu1 %1407 }
0x111e   :  { %2443 = vmatmul.mubr.msk.f32.vlgmr.msra.gmra.mrb[18].mxu0 %vm62_vm1, %v1408_v11 }
0x111f   :  { %2625 = vmatpush3.bf16.msra.mxu0 %v2983_v41  ;;  %2461 = vmatprep.mubr.msk.f32.mxu0 %vm2844_vm0, %v2845_v1 }
0x1120   :  { %2626 = vmatprep.subr.bf16.mxu0 %v2843_v0 }
0x1122   :  { %v1412_v13 = vpop.permute.xlu0 %1411 }
0x1123   :  { %v1414_v16 = vsel %vm62_vm1, %v1408_v11, %v1412_v13  ;;  %2628 = vmatpush3.bf16.msra.mxu0 %v3000_v46 }
0x1124   :  { %2432 = vmatmul.mubr.msk.f32.vlgmr.msra.gmra.mrb[12].mxu1 %vm365_vm6, %v1414_v16  ;;  %2629 = vmatprep.subr.bf16.mxu0 %v2843_v0 }
0x1125   :  { %2637 = vmatpush3.bf16.msra.mxu1 %v2933_v8  ;;  %2472 = vmatprep.mubr.msk.f32.mxu1 %vm2844_vm0, %v2845_v1  ;;  %v206_v8 = vadd.f32 %v2957_v14, %v3053_v3 }
0x1126   :  { %2638 = vmatprep.subr.bf16.mxu1 %v2843_v0 }
0x1127   :  { %2631 = vmatpush3.bf16.msra.mxu0 %v3018_v51 }
0x1128   :  { %2632 = vmatprep.subr.bf16.mxu0 %v2843_v0 }
0x1129   :  { %2640 = vmatpush3.bf16.msra.mxu1 %v2940_v12 }
0x112a   :  { %2641 = vmatprep.subr.bf16.mxu1 %v2843_v0 }
0x112b   :  { %2634 = vmatpush3.bf16.msra.mxu0 %v3034_v56 }
0x112c   :  { %2653 = vmatprep.subr.bf16.mxu0 %v2843_v0 }
0x11f1   :  { %v1584_v17 = vpop.f32.mrb[18].mxu0 }
0x11f2   :  { %v1588_v18 = vadd.f32 %v1584_v17, %v206_v8  ;;  %v2444_v19 = vpop.f32.mrb[19].mxu0 }
0x11f4   :  { %v2098_v20 = vmul.f32 -1.442695, %v1588_v18 }
0x11f6   :  { %2736 = vpow2.f32 %v2098_v20 }
0x11f7   :  { %v1484_v21 = vpop.f32.mrb[12].mxu1 }
0x11f8   :  { %v1485_v61 = vadd.f32 %v3079_v9, %v1484_v21  ;;  %v2433_v22 = vpop.f32.mrb[13].mxu1 }
0x11fa   :  { %v2095_v23 = vmul.f32 -1.442695, %v1485_v61 }
0x11fc   :  { %2738 = vpow2.f32 %v2095_v23 }
0x1200   :  { %v2737_v12 = vpop.eup %2736 }
0x1201   :  { %v1592_v15 = vadd.f32 1.0, %v2737_v12 }
0x1203   :  { %2740 = vrcp.f32 %v1592_v15 }
0x1206   :  { %v2739_v24 = vpop.eup %2738 }
0x1207   :  { %v1491_v25 = vadd.f32 1.0, %v2739_v24 }
0x1209   :  { %2742 = vrcp.f32 %v1491_v25 }
0x120d   :  { %v2741_v26 = vpop.eup %2740 }
0x120e   :  { %v1595_v27 = vmul.f32 2.0, %v2741_v26 }
0x1210   :  { %v2099_v14 = vadd.f32 -1.0, %v1595_v27 }
0x1212   :  { %v1597_v3 = vsel %vm2962_vm5, %v2099_v14, %v2741_v26 }
0x1213   :  { %v2743_v29 = vpop.eup %2742  ;;  %1600 = vrot.lane.b32.xlu0 %v1597_v3, %s2846_s13  ;;  %v1598_v38 = vmul.f32 %v1597_v3, %v3259_v55 }
0x1214   :  { %v1494_v30 = vmul.f32 2.0, %v2743_v29 }
0x1216   :  { %v2096_v31 = vadd.f32 -1.0, %v1494_v30 }
0x1218   :  { %v1496_v32 = vsel %vm2962_vm5, %v2096_v31, %v2743_v29 }
0x1219   :  { %1499 = vrot.lane.b32.xlu1 %v1496_v32, %s2846_s13  ;;  %v1497_v42 = vmul.f32 %v1496_v32, %v3263_v59 }
0x1285   :  { %v1601_v33 = vpop.permute.xlu0 %1600 }
0x1286   :  { %v1603_v34 = vmul.f32 %v1601_v33, %v1597_v3 }
0x1288   :  { %1605 = vrot.lane.b32.xlu0 %v1603_v34, %s2847_s14 }
0x128b   :  { %v1500_v35 = vpop.permute.xlu1 %1499 }
0x128c   :  { %v1502_v36 = vmul.f32 %v1500_v35, %v1496_v32 }
0x128e   :  { %1504 = vrot.lane.b32.xlu1 %v1502_v36, %s2847_s14 }
0x12fa   :  { %v1606_v39 = vpop.permute.xlu0 %1605 }
0x12fb   :  { %v3301_v40 = vadd.f32 %v1606_v39, %v1598_v38 }
0x12fd   :  { %2744 = vtanh.f32 %v3301_v40 }
0x1300   :  { %v1505_v43 = vpop.permute.xlu1 %1504 }
0x1301   :  { %v3305_v62 = vadd.f32 %v1505_v43, %v1497_v42 }
0x1303   :  { %2746 = vtanh.f32 %v3305_v62 }
0x1307   :  { %v2745_v44 = vpop.eup %2744 }
0x1308   :  { %1611 = vrot.lane.b32.xlu0 %v2745_v44, %s2846_s13 }
0x130d   :  { %v2747_v45 = vpop.eup %2746 }
0x130e   :  { %1510 = vrot.lane.b32.xlu1 %v2747_v45, %s2846_s13 }
0x137a   :  { %v1612_v47 = vpop.permute.xlu0 %1611 }
0x137b   :  { %v1614_v48 = vmul.f32 %v1612_v47, %v1597_v3 }
0x137d   :  { %1616 = vrot.lane.b32.xlu1 %v1614_v48, %s2847_s14  ;;  %v1951_v48 = vld [vmem:[%s3393_s6] sm:$0xff] }
0x1380   :  { %v1511_v49 = vpop.permute.xlu1 %1510 }
0x1381   :  { %v1513_v50 = vmul.f32 %v1511_v49, %v1496_v32  ;;  %v1952_v49 = vld [vmem:[%s3393_s6 + $0x8] sm:$0xff] }
0x1383   :  { %1620 = vrot.lane.b32.xlu0 %v1513_v50, %s2846_s13  ;;  %v2654_v50 = vpack.c.bf16 %v1952_v49, %v1951_v48 }
0x13ef   :  { %v1617_v52 = vpop.permute.xlu1 %1616 }
0x13f0   :  { %2473 = vmatmul.mubr.msk.f32.vlgmr.msra.gmra.mrb[14].mxu1 %vm62_vm1, %v1617_v52 }
0x13f1   :  { %2643 = vmatpush3.bf16.msra.mxu1 %v2983_v41  ;;  %2491 = vmatprep.mubr.msk.f32.mxu1 %vm2844_vm0, %v2845_v1  ;;  %v2766_v41 = vld [vmem:[%s3390_s3] ss:$0 sm:$0xff] }
0x13f2   :  { %2644 = vmatprep.subr.bf16.mxu1 %v2843_v0 }
0x13f5   :  { %v1621_v37 = vpop.permute.xlu0 %1620  ;;  %2646 = vmatpush3.bf16.msra.mxu1 %v3000_v46  ;;  %v211_v46 = vadd.f32 %v2766_v41, %v3051_v2 }
0x13f6   :  { %v1623_v53 = vsel %vm62_vm1, %v1617_v52, %v1621_v37  ;;  %2647 = vmatprep.subr.bf16.mxu1 %v2843_v0  ;;  %v1954_v52 = vld [vmem:[%s3393_s6 + $0x18] sm:$0xff] }
0x13f7   :  { %2462 = vmatmul.mubr.msk.f32.vlgmr.msra.gmra.mrb[20].mxu0 %vm365_vm6, %v1623_v53  ;;  %v2657_v37 = vpack.c.bf16 %v1954_v52, %v1953_v28 }
0x13f8   :  { %2502 = vmatprep.mubr.msk.f32.mxu0 %vm2844_vm0, %v2845_v1  ;;  %2655 = vmatpush3.bf16.msra.mxu0 %v2654_v50 }
0x13f9   :  { %2649 = vmatpush3.bf16.msra.mxu1 %v3018_v51  ;;  %2656 = vmatprep.subr.bf16.mxu0 %v2843_v0 }
0x13fa   :  { %2650 = vmatprep.subr.bf16.mxu1 %v2843_v0 }
0x13fc   :  { %2658 = vmatpush3.bf16.msra.mxu0 %v2657_v37 }
0x13fd   :  { %2652 = vmatpush3.bf16.msra.mxu1 %v3034_v56 }
0x14c3   :  { %v1793_v54 = vpop.f32.mrb[14].mxu1 }
0x14c4   :  { %v1797_v63 = vadd.f32 %v1793_v54, %v211_v46  ;;  %v2474_v55 = vpop.f32.mrb[15].mxu1 }
0x14c5   :  { %v2109_v55 = vld [vmem:[%s3394_s7] ss:$0 sm:$0xff] }
0x14c6   :  { %v2104_v57 = vmul.f32 -1.442695, %v1797_v63 }
0x14c8   :  { %2748 = vpow2.f32 %v2104_v57 }
0x14ca   :  { %v1693_v58 = vpop.f32.mrb[20].mxu0 }
0x14cb   :  { %v1694_v1 = vadd.f32 %v3079_v9, %v1693_v58  ;;  %v2463_v59 = vpop.f32.mrb[21].mxu0 }
0x14cd   :  { %v2101_v51 = vmul.f32 -1.442695, %v1694_v1 }
0x14cf   :  { %2750 = vpow2.f32 %v2101_v51 }
0x14d2   :  { %v2749_v4 = vpop.eup %2748 }
0x14d3   :  { %v1801_v5 = vadd.f32 1.0, %v2749_v4 }
0x14d5   :  { %2752 = vrcp.f32 %v1801_v5 }
0x14d9   :  { %v2751_v56 = vpop.eup %2750 }
0x14da   :  { %v1700_v6 = vadd.f32 1.0, %v2751_v56 }
0x14dc   :  { %2754 = vrcp.f32 %v1700_v6 }
0x14df   :  { %v2753_v7 = vpop.eup %2752 }
0x14e0   :  { %v1804_v10 = vmul.f32 2.0, %v2753_v7 }
0x14e2   :  { %v2105_v2 = vadd.f32 -1.0, %v1804_v10 }
0x14e4   :  { %v1806_v60 = vsel %vm2962_vm5, %v2105_v2, %v2753_v7 }
0x14e5   :  { %1809 = vrot.lane.b32.xlu0 %v1806_v60, %s2846_s13  ;;  %v1807_v21 = vmul.f32 %v1806_v60, %v3301_v40 }
0x14e6   :  { %v2755_v11 = vpop.eup %2754 }
0x14e7   :  { %v1703_v13 = vmul.f32 2.0, %v2755_v11 }
0x14e9   :  { %v2102_v16 = vadd.f32 -1.0, %v1703_v13 }
0x14eb   :  { %v1705_v8 = vsel %vm2962_vm5, %v2102_v16, %v2755_v11 }
0x14ec   :  { %1708 = vrot.lane.b32.xlu1 %v1705_v8, %s2846_s13  ;;  %v1706_v23 = vmul.f32 %v1705_v8, %v3305_v62 }
0x1557   :  { %v1810_v17 = vpop.permute.xlu0 %1809 }
0x1558   :  { %v1812_v18 = vmul.f32 %v1810_v17, %v1806_v60 }
0x155a   :  { %1814 = vrot.lane.b32.xlu0 %v1812_v18, %s2847_s14 }
0x155e   :  { %v1709_v19 = vpop.permute.xlu1 %1708 }
0x155f   :  { %v1711_v20 = vmul.f32 %v1709_v19, %v1705_v8 }
0x1561   :  { %1713 = vrot.lane.b32.xlu1 %v1711_v20, %s2847_s14 }
0x15cc   :  { %v1815_v61 = vpop.permute.xlu0 %1814 }
0x15cd   :  { %v1817_v22 = vadd.f32 %v1815_v61, %v1807_v21 }
0x15cf   :  { %2756 = vtanh.f32 %v1817_v22 }
0x15d3   :  { %v1714_v12 = vpop.permute.xlu1 %1713 }
0x15d4   :  { %v1716_v15 = vadd.f32 %v1714_v12, %v1706_v23 }
0x15d6   :  { %2758 = vtanh.f32 %v1716_v15 }
0x15d9   :  { %v2757_v24 = vpop.eup %2756 }
0x15da   :  { %1820 = vrot.lane.b32.xlu0 %v2757_v24, %s2846_s13 }
0x15e0   :  { %v2759_v25 = vpop.eup %2758 }
0x15e1   :  { %1719 = vrot.lane.b32.xlu1 %v2759_v25, %s2846_s13 }
0x164c   :  { %v1821_v26 = vpop.permute.xlu0 %1820 }
0x164d   :  { %v1823_v27 = vmul.f32 %v1821_v26, %v1806_v60 }
0x164f   :  { %1825 = vrot.lane.b32.xlu1 %v1823_v27, %s2847_s14 }
0x1653   :  { %v1720_v14 = vpop.permute.xlu1 %1719 }
0x1654   :  { %v1722_v3 = vmul.f32 %v1720_v14, %v1705_v8 }
0x1656   :  { %1829 = vrot.lane.b32.xlu0 %v1722_v3, %s2846_s13 }
0x16c1   :  { %v1826_v29 = vpop.permute.xlu1 %1825 }
0x16c2   :  { %1932 = vst.msk [vmem:[#allocation2] sm:$0xff] %vm62_vm1, %v1826_v29 }
0x16c8   :  { %v1830_v30 = vpop.permute.xlu0 %1829 }
0x16c9   :  { %v1832_v31 = vsel %vm62_vm1, %v1826_v29, %v1830_v30 }
0x16ca   :  { %2492 = vmatmul.mubr.msk.f32.vlgmr.msra.gmra.mrb[16].mxu1 %vm365_vm6, %v1832_v31 }
0x179d   :  { %v1902_v32 = vpop.f32.mrb[16].mxu1 }
0x179e   :  { %v1903_v33 = vadd.f32 %v3079_v9, %v1902_v32  ;;  %v2493_v34 = vpop.f32.mrb[17].mxu1 }
0x17a0   :  { %v2107_v35 = vmul.f32 -1.442695, %v1903_v33 }
0x17a2   :  { %2760 = vpow2.f32 %v2107_v35 }
0x17ac   :  { %v2761_v36 = vpop.eup %2760 }
0x17ad   :  { %v1909_v38 = vadd.f32 1.0, %v2761_v36 }
0x17af   :  { %2762 = vrcp.f32 %v1909_v38 }
0x17b9   :  { %v2763_v39 = vpop.eup %2762 }
0x17ba   :  { %v1912_v40 = vmul.f32 2.0, %v2763_v39 }
0x17bc   :  { %v2108_v42 = vadd.f32 -1.0, %v1912_v40 }
0x17be   :  { %v1914_v43 = vsel %vm2962_vm5, %v2108_v42, %v2763_v39 }
0x17bf   :  { %1917 = vrot.lane.b32.xlu1 %v1914_v43, %s2846_s13  ;;  %v1915_v45 = vmul.f32 %v1914_v43, %v1716_v15 }
0x1831   :  { %v1918_v62 = vpop.permute.xlu1 %1917 }
0x1832   :  { %v1920_v44 = vmul.f32 %v1918_v62, %v1914_v43 }
0x1834   :  { %1922 = vrot.lane.b32.xlu0 %v1920_v44, %s2847_s14 }
0x18a6   :  { %v1923_v9 = vpop.permute.xlu0 %1922 }
0x18a7   :  { %v1925_v47 = vadd.f32 %v1923_v9, %v1915_v45 }
0x18a9   :  { %2764 = vtanh.f32 %v1925_v47 }
0x18b3   :  { %v2765_v53 = vpop.eup %2764 }
0x18b4   :  { %1928 = vrot.lane.b32.xlu1 %v2765_v53, %s2846_s13 }
0x18b8   :  { %1934 = vrot.lane.b32.xlu1 %v1817_v22, %s2848_s1 }
0x1926   :  { %v1929_v41 = vpop.permute.xlu1 %1928 }
0x1927   :  { %v1931_v46 = vmul.f32 %v1929_v41, %v1914_v43 }
0x1929   :  { %1939 = vrot.lane.b32.xlu0 %v1931_v46, %s2847_s14  ;;  %s2811_s14 = scalar_lea.vmem %s2042_s2, 128 }
0x192a   :  { %v1935_v54 = vpop.permute.xlu1 %1934  ;;  %p2812_p2 = scmp.ne.s32.totalorder %s2042_s2, %s2811_s14  ;;  %p2817_p4 = scmp.lt.s32.totalorder %s2811_s14, %s2811_s14 }
0x192b   :  { %1937 = vst.msk [vmem:[#allocation3] sm:$0xff] %vm62_vm1, %v1935_v54 }
0x192c   :  { %p2818_p5 = por %p2817_p4, %p2816_p3 }
0x192d   :  { %1944 = vrot.lane.b32.xlu0 %v1925_v47, %s2848_s1 }
0x192e   :  { %p2819_p6 = pnand %p2818_p5, %p2812_p2 }
0x199b   :  { %v1940_v63 = vpop.permute.xlu0 %1939 }
0x199c   :  { %1942 = vst.msk [vmem:[#allocation4] sm:$0xff] %vm62_vm1, %v1940_v63  ;;  %2503 = vmatmul.mubr.msk.f32.vlgmr.msra.gmra.mrb[22].mxu0 %vm62_vm1, %v1940_v63 }
0x199f   :  { %v1945_v0 = vpop.permute.xlu0 %1944 }
0x19a0   :  { %1947 = vst.msk [vmem:[#allocation5] sm:$0xff] %vm62_vm1, %v1945_v0 }
0x1a6f   :  { %v2030_v57 = vpop.f32.mrb[22].mxu0 }
0x1a70   :  { %v2031_v58 = vadd.f32 %v2109_v55, %v2030_v57  ;;  %v2504_v1 = vpop.f32.mrb[23].mxu0 }
0x1a72   :  { %2034 = vst [vmem:[#allocation12] sm:$0xff] %v2031_v58 }
0x1a73   :  { %2822 = shalt.err (!%p2819_p6)
}
0x1a74   :  { %s2823_s10 = scalar_lea.hbm %s3395_s8, 128 }
0x1a75   :  { %p2824_p7 = scmp.ne.s32.totalorder %s3395_s8, %s2823_s10  ;;  %p2827_p8 = scmp.lt.u32.totalorder %s2823_s10, %s3395_s8 }
0x1a77   :  { %p2829_p9 = pnand %p2827_p8, %p2824_p7 }
0x1a79   :  { %2832 = shalt.err (!%p2829_p9)
}
0x1a7a   :  { %2044 = dma.vmem_to_hbm [thread:$0]  %s2042_s2, 128, %s3395_s8, [#allocation9]  }
0x1a7b   :  { %2837 = dma.done.wait [#allocation9], 128  }
0x1a7c   :  { %2838 = vsyncadd [#allocation9], 4294967168 }
0x1a7d   :  { %2048 = vsyncpa [#allocation8], 1 }
0x1a7e   :  { %2049 = vsyncpa [#allocation11], 1 }
0x1a7f   :  { %2050 = vsyncpa [#allocation9], 1 }

</bundles_post_ra>
